<compile_context>
chip_gen: v7x
topology: tpu7x:2x2x1
jax: 0.10.0
libtpu: 0.0.40
codegen_flags: <defaults>
</compile_context>

<pallas_src>
import functools

import jax
import jax.numpy as jnp
from jax.experimental import pallas as pl
from jax.experimental.pallas import tpu as pltpu


def _round_up(a, b):
    return (a + b - 1) // b * b


# ----------------------------- Pallas kernel ------------------------------- #
def _conv_taps_kernel(x_ref, w_ref, b_ref, o_ref, *, taps, m_rows, cout_p,
                      neg_slope, apply_act):
    """9-tap 3x3 conv as shifted-row matmuls, fused bias + LeakyReLU.

    x_ref: (1, P, Lp, Cinp)  flattened (phase-decomposed) padded image, VMEM resident
    w_ref: (9, Cinp, CoutP)  per-tap weights (grid-invariant)
    b_ref: (1, CoutP)
    o_ref: (1, m_rows, CoutP)
    """
    acc = jnp.zeros((m_rows, cout_p), jnp.float32)
    for t, (phase, off) in enumerate(taps):
        lhs = x_ref[0, phase, pl.ds(off, m_rows), :]          # (m_rows, Cinp)
        acc += jnp.dot(lhs, w_ref[t], preferred_element_type=jnp.float32)
    y = acc + b_ref[...]
    if apply_act:
        y = jnp.where(y >= 0, y, neg_slope * y)
    o_ref[0] = y.astype(o_ref.dtype)


# ------------------------------- wrapper ------------------------------------ #
def conv3x3_pallas(x_nhwc, w_taps, b, stride, apply_act, neg_slope=0.2):
    """3x3 conv, padding=1, stride in {1,2}, optional LeakyReLU(0.2). NHWC in/out."""
    N, H, W, Cin = x_nhwc.shape
    _, _, Cout = w_taps.shape
    assert stride in (1, 2)
    if stride == 2:
        assert H % 2 == 0 and W % 2 == 0, "stride-2 layers assume even H, W"

    Ho = (H + 2 - 3) // stride + 1
    Wo = (W + 2 - 3) // stride + 1

    Cinp = max(8, _round_up(Cin, 8))       # sublane-friendly contraction depth (f32)
    CoutP = _round_up(Cout, 128)           # lane-dense output stores

    # ---- glue: pad (+ phase decomposition for stride 2). ~1-2x input bytes. ----
    xp = jnp.pad(x_nhwc, ((0, 0), (1, 1), (1, 1), (0, 0)))
    if Cinp != Cin:
        xp = jnp.pad(xp, ((0, 0), (0, 0), (0, 0), (0, Cinp - Cin)))

    if stride == 1:
        Wq = W + 2                                   # row pitch in flattened space
        n_phase = 1
        A = xp.reshape(N, 1, (H + 2) * Wq, Cinp)
        taps = [(0, dy * Wq + dx) for dy in range(3) for dx in range(3)]
    else:
        Hq, Wq = Ho + 1, Wo + 1
        n_phase = 4
        # phase grid: A[n, 2*p+q, i*Wq+j, c] = xp[n, 2i+p, 2j+q, c]
        A = (xp.reshape(N, Hq, 2, Wq, 2, Cinp)
               .transpose(0, 2, 4, 1, 3, 5)
               .reshape(N, 4, Hq * Wq, Cinp))
        taps = [((dy % 2) * 2 + (dx % 2), (dy // 2) * Wq + (dx // 2))
                for dy in range(3) for dx in range(3)]

    # Kernel computes m_rows = Ho*Wq flattened positions; the (Wq-Wo) extra
    # columns per row are garbage and sliced off below (never fed forward).
    m_rows = Ho * Wq
    A = jnp.pad(A, ((0, 0), (0, 0), (0, 8), (0, 0)))   # slack: every tap slice in-bounds
    Lp = A.shape[2]

    w2 = w_taps
    if Cinp != Cin:
        w2 = jnp.pad(w2, ((0, 0), (0, Cinp - Cin), (0, 0)))
    if CoutP != Cout:
        w2 = jnp.pad(w2, ((0, 0), (0, 0), (0, CoutP - Cout)))
        b = jnp.pad(b, (0, CoutP - Cout))
    b2 = b.reshape(1, CoutP)

    # Explicit VMEM budget (double-buffered input/output + resident weights);
    # v5e's default scoped limit is only 16 MiB.
    need = (2 * (n_phase * Lp * Cinp + m_rows * CoutP)
            + 2 * (9 * Cinp * CoutP + CoutP)) * 4 + (4 << 20)
    vmem_limit = int(max(32 * 1024 * 1024, min(need, 100 * 1024 * 1024)))

    kernel = functools.partial(
        _conv_taps_kernel, taps=taps, m_rows=m_rows, cout_p=CoutP,
        neg_slope=neg_slope, apply_act=apply_act)

    out = pl.pallas_call(
        kernel,
        out_shape=jax.ShapeDtypeStruct((N, m_rows, CoutP), x_nhwc.dtype),
        grid_spec=pltpu.PrefetchScalarGridSpec(
            num_scalar_prefetch=0,
            grid=(N,),
            in_specs=[
                pl.BlockSpec((1, n_phase, Lp, Cinp), lambda n: (n, 0, 0, 0)),
                pl.BlockSpec((9, Cinp, CoutP), lambda n: (0, 0, 0)),   # resident
                pl.BlockSpec((1, CoutP), lambda n: (0, 0)),            # bias
            ],
            out_specs=pl.BlockSpec((1, m_rows, CoutP), lambda n: (n, 0, 0)),
        ),
        compiler_params=pltpu.CompilerParams(
            dimension_semantics=("parallel",),
            vmem_limit_bytes=vmem_limit,
        ),
    )(A, w2, b2)

    return out.reshape(N, Ho, Wq, CoutP)[:, :, :Wo, :Cout]


# --------------------------- parameters / model ----------------------------- #
def init_discriminator_params(key, in_channels=1, channel_list=(16, 32, 64, 128)):
    """Deterministic init matching the nn.Module's layer shapes (kaiming-uniform-ish)."""
    layer_defs = [(in_channels, channel_list[0], 1, True)]
    for i in range(len(channel_list) - 1):
        layer_defs.append((channel_list[i], channel_list[i], 2, True))
        layer_defs.append((channel_list[i], channel_list[i + 1], 1, True))
    layer_defs.append((channel_list[-1], 1, 1, False))  # self.out

    params = []
    for (cin, cout, stride, act) in layer_defs:
        key, kw, kb = jax.random.split(key, 3)
        bound = 1.0 / float(jnp.sqrt(cin * 9))
        w = jax.random.uniform(kw, (cout, cin, 3, 3), jnp.float32, -bound, bound)
        b = jax.random.uniform(kb, (cout,), jnp.float32, -bound, bound)
        # (Cout, Cin, kh, kw) -> (kh*kw, Cin, Cout) tap layout used by the kernel.
        w_taps = jnp.transpose(w, (2, 3, 1, 0)).reshape(9, cin, cout)
        params.append(dict(w_taps=w_taps, b=b, stride=stride, act=act))
    return params


def discriminator_forward(params, x_nchw):
    x = jnp.transpose(x_nchw, (0, 2, 3, 1))  # NCHW -> NHWC
    for p in params:
        x = conv3x3_pallas(x, p["w_taps"], p["b"], p["stride"], p["act"])
    return jnp.transpose(x, (0, 3, 1, 2))    # NHWC -> NCHW


# ------------------------------ reference ----------------------------------- #
def _ref_forward(params, x_nchw):
    x = jnp.transpose(x_nchw, (0, 2, 3, 1))
    for p in params:
        w = p["w_taps"].reshape(3, 3, p["w_taps"].shape[1], p["w_taps"].shape[2])  # HWIO
        x = jax.lax.conv_general_dilated(
            x, w, window_strides=(p["stride"], p["stride"]),
            padding=((1, 1), (1, 1)),
            dimension_numbers=("NHWC", "HWIO", "NHWC"),
        ) + p["b"]
        if p["act"]:
            x = jnp.where(x >= 0, x, 0.2 * x)
    return jnp.transpose(x, (0, 3, 1, 2))


if __name__ == "__main__":
    key = jax.random.PRNGKey(0)
    kp, kx = jax.random.split(key)

    params = init_discriminator_params(kp, in_channels=1, channel_list=(16, 32, 64, 128))
    x = jax.random.normal(kx, (2, 1, 16, 16), jnp.float32)  # NCHW, like the PyTorch module

    out = jax.block_until_ready(discriminator_forward(params, x))
    assert out.shape == (2, 1, 2, 2), out.shape  # 16 -> 8 -> 4 -> 2 via three stride-2 convs

    ref = jax.block_until_ready(_ref_forward(params, x))
    assert jnp.allclose(out, ref, atol=1e-4, rtol=1e-4), float(jnp.max(jnp.abs(out - ref)))

    print("KERNEL_OK")
</pallas_src>

<mosaic_0001>
module attributes {stable_mosaic.version = 11 : i64} {
  func.func @_conv_taps_kernel(%arg0: i32, %arg1: memref<1x1x332x8xf32, #tpu.memory_space<vmem>>, %arg2: memref<9x8x128xf32, #tpu.memory_space<vmem>>, %arg3: memref<1x128xf32, #tpu.memory_space<vmem>>, %arg4: memref<1x288x128xf32, #tpu.memory_space<vmem>>) attributes {dimension_semantics = [#tpu.dimension_semantics<parallel>], iteration_bounds = array<i64: 2>, scalar_prefetch = 0 : i64, scratch_operands = 0 : i64, tpu.core_type = #tpu.core_type<tc>, window_params = [{transform_indices = @transform_0, window_bounds = array<i64: 1, 1, 332, 8>}, {pipeline_mode = #tpu.pipeline_mode<synchronous>, transform_indices = @transform_1, window_bounds = array<i64: 9, 8, 128>}, {pipeline_mode = #tpu.pipeline_mode<synchronous>, transform_indices = @transform_2, window_bounds = array<i64: 1, 128>}, {transform_indices = @transform_3, window_bounds = array<i64: 1, 288, 128>}]} {
    %cst = arith.constant 0.000000e+00 : f32
    %0 = vector.broadcast %cst : f32 to vector<288x128xf32>
    %c0 = arith.constant 0 : index
    %c0_0 = arith.constant 0 : index
    %c0_1 = arith.constant 0 : index
    %c0_2 = arith.constant 0 : index
    %1 = vector.load %arg1[%c0, %c0_0, %c0_1, %c0_2] : memref<1x1x332x8xf32, #tpu.memory_space<vmem>>, vector<1x1x288x8xf32>
    %2 = vector.shape_cast %1 : vector<1x1x288x8xf32> to vector<288x8xf32>
    %c0_3 = arith.constant 0 : index
    %c0_4 = arith.constant 0 : index
    %c0_5 = arith.constant 0 : index
    %3 = vector.load %arg2[%c0_3, %c0_4, %c0_5] : memref<9x8x128xf32, #tpu.memory_space<vmem>>, vector<1x8x128xf32>
    %4 = vector.shape_cast %3 : vector<1x8x128xf32> to vector<8x128xf32>
    %cst_6 = arith.constant dense<0.000000e+00> : vector<288x128xf32>
    %5 = tpu.matmul %2, %4, %cst_6 {dimension_numbers = #tpu.dot_dimension_numbers<[1], [0], [0], [1], [0, 0, 1, 1], [], []>} : vector<288x8xf32>, vector<8x128xf32>, vector<288x128xf32> -> vector<288x128xf32>
    %6 = arith.addf %0, %5 : vector<288x128xf32>
    %c0_7 = arith.constant 0 : index
    %c0_8 = arith.constant 0 : index
    %c1 = arith.constant 1 : index
    %c0_9 = arith.constant 0 : index
    %7 = vector.load %arg1[%c0_7, %c0_8, %c1, %c0_9] : memref<1x1x332x8xf32, #tpu.memory_space<vmem>>, vector<1x1x288x8xf32>
    %8 = vector.shape_cast %7 : vector<1x1x288x8xf32> to vector<288x8xf32>
    %c1_10 = arith.constant 1 : index
    %c0_11 = arith.constant 0 : index
    %c0_12 = arith.constant 0 : index
    %9 = vector.load %arg2[%c1_10, %c0_11, %c0_12] : memref<9x8x128xf32, #tpu.memory_space<vmem>>, vector<1x8x128xf32>
    %10 = vector.shape_cast %9 : vector<1x8x128xf32> to vector<8x128xf32>
    %cst_13 = arith.constant dense<0.000000e+00> : vector<288x128xf32>
    %11 = tpu.matmul %8, %10, %cst_13 {dimension_numbers = #tpu.dot_dimension_numbers<[1], [0], [0], [1], [0, 0, 1, 1], [], []>} : vector<288x8xf32>, vector<8x128xf32>, vector<288x128xf32> -> vector<288x128xf32>
    %12 = arith.addf %6, %11 : vector<288x128xf32>
    %c0_14 = arith.constant 0 : index
    %c0_15 = arith.constant 0 : index
    %c2 = arith.constant 2 : index
    %c0_16 = arith.constant 0 : index
    %13 = vector.load %arg1[%c0_14, %c0_15, %c2, %c0_16] : memref<1x1x332x8xf32, #tpu.memory_space<vmem>>, vector<1x1x288x8xf32>
    %14 = vector.shape_cast %13 : vector<1x1x288x8xf32> to vector<288x8xf32>
    %c2_17 = arith.constant 2 : index
    %c0_18 = arith.constant 0 : index
    %c0_19 = arith.constant 0 : index
    %15 = vector.load %arg2[%c2_17, %c0_18, %c0_19] : memref<9x8x128xf32, #tpu.memory_space<vmem>>, vector<1x8x128xf32>
    %16 = vector.shape_cast %15 : vector<1x8x128xf32> to vector<8x128xf32>
    %cst_20 = arith.constant dense<0.000000e+00> : vector<288x128xf32>
    %17 = tpu.matmul %14, %16, %cst_20 {dimension_numbers = #tpu.dot_dimension_numbers<[1], [0], [0], [1], [0, 0, 1, 1], [], []>} : vector<288x8xf32>, vector<8x128xf32>, vector<288x128xf32> -> vector<288x128xf32>
    %18 = arith.addf %12, %17 : vector<288x128xf32>
    %c0_21 = arith.constant 0 : index
    %c0_22 = arith.constant 0 : index
    %c18 = arith.constant 18 : index
    %c0_23 = arith.constant 0 : index
    %19 = vector.load %arg1[%c0_21, %c0_22, %c18, %c0_23] : memref<1x1x332x8xf32, #tpu.memory_space<vmem>>, vector<1x1x288x8xf32>
    %20 = vector.shape_cast %19 : vector<1x1x288x8xf32> to vector<288x8xf32>
    %c3 = arith.constant 3 : index
    %c0_24 = arith.constant 0 : index
    %c0_25 = arith.constant 0 : index
    %21 = vector.load %arg2[%c3, %c0_24, %c0_25] : memref<9x8x128xf32, #tpu.memory_space<vmem>>, vector<1x8x128xf32>
    %22 = vector.shape_cast %21 : vector<1x8x128xf32> to vector<8x128xf32>
    %cst_26 = arith.constant dense<0.000000e+00> : vector<288x128xf32>
    %23 = tpu.matmul %20, %22, %cst_26 {dimension_numbers = #tpu.dot_dimension_numbers<[1], [0], [0], [1], [0, 0, 1, 1], [], []>} : vector<288x8xf32>, vector<8x128xf32>, vector<288x128xf32> -> vector<288x128xf32>
    %24 = arith.addf %18, %23 : vector<288x128xf32>
    %c0_27 = arith.constant 0 : index
    %c0_28 = arith.constant 0 : index
    %c19 = arith.constant 19 : index
    %c0_29 = arith.constant 0 : index
    %25 = vector.load %arg1[%c0_27, %c0_28, %c19, %c0_29] : memref<1x1x332x8xf32, #tpu.memory_space<vmem>>, vector<1x1x288x8xf32>
    %26 = vector.shape_cast %25 : vector<1x1x288x8xf32> to vector<288x8xf32>
    %c4 = arith.constant 4 : index
    %c0_30 = arith.constant 0 : index
    %c0_31 = arith.constant 0 : index
    %27 = vector.load %arg2[%c4, %c0_30, %c0_31] : memref<9x8x128xf32, #tpu.memory_space<vmem>>, vector<1x8x128xf32>
    %28 = vector.shape_cast %27 : vector<1x8x128xf32> to vector<8x128xf32>
    %cst_32 = arith.constant dense<0.000000e+00> : vector<288x128xf32>
    %29 = tpu.matmul %26, %28, %cst_32 {dimension_numbers = #tpu.dot_dimension_numbers<[1], [0], [0], [1], [0, 0, 1, 1], [], []>} : vector<288x8xf32>, vector<8x128xf32>, vector<288x128xf32> -> vector<288x128xf32>
    %30 = arith.addf %24, %29 : vector<288x128xf32>
    %c0_33 = arith.constant 0 : index
    %c0_34 = arith.constant 0 : index
    %c20 = arith.constant 20 : index
    %c0_35 = arith.constant 0 : index
    %31 = vector.load %arg1[%c0_33, %c0_34, %c20, %c0_35] : memref<1x1x332x8xf32, #tpu.memory_space<vmem>>, vector<1x1x288x8xf32>
    %32 = vector.shape_cast %31 : vector<1x1x288x8xf32> to vector<288x8xf32>
    %c5 = arith.constant 5 : index
    %c0_36 = arith.constant 0 : index
    %c0_37 = arith.constant 0 : index
    %33 = vector.load %arg2[%c5, %c0_36, %c0_37] : memref<9x8x128xf32, #tpu.memory_space<vmem>>, vector<1x8x128xf32>
    %34 = vector.shape_cast %33 : vector<1x8x128xf32> to vector<8x128xf32>
    %cst_38 = arith.constant dense<0.000000e+00> : vector<288x128xf32>
    %35 = tpu.matmul %32, %34, %cst_38 {dimension_numbers = #tpu.dot_dimension_numbers<[1], [0], [0], [1], [0, 0, 1, 1], [], []>} : vector<288x8xf32>, vector<8x128xf32>, vector<288x128xf32> -> vector<288x128xf32>
    %36 = arith.addf %30, %35 : vector<288x128xf32>
    %c0_39 = arith.constant 0 : index
    %c0_40 = arith.constant 0 : index
    %c36 = arith.constant 36 : index
    %c0_41 = arith.constant 0 : index
    %37 = vector.load %arg1[%c0_39, %c0_40, %c36, %c0_41] : memref<1x1x332x8xf32, #tpu.memory_space<vmem>>, vector<1x1x288x8xf32>
    %38 = vector.shape_cast %37 : vector<1x1x288x8xf32> to vector<288x8xf32>
    %c6 = arith.constant 6 : index
    %c0_42 = arith.constant 0 : index
    %c0_43 = arith.constant 0 : index
    %39 = vector.load %arg2[%c6, %c0_42, %c0_43] : memref<9x8x128xf32, #tpu.memory_space<vmem>>, vector<1x8x128xf32>
    %40 = vector.shape_cast %39 : vector<1x8x128xf32> to vector<8x128xf32>
    %cst_44 = arith.constant dense<0.000000e+00> : vector<288x128xf32>
    %41 = tpu.matmul %38, %40, %cst_44 {dimension_numbers = #tpu.dot_dimension_numbers<[1], [0], [0], [1], [0, 0, 1, 1], [], []>} : vector<288x8xf32>, vector<8x128xf32>, vector<288x128xf32> -> vector<288x128xf32>
    %42 = arith.addf %36, %41 : vector<288x128xf32>
    %c0_45 = arith.constant 0 : index
    %c0_46 = arith.constant 0 : index
    %c37 = arith.constant 37 : index
    %c0_47 = arith.constant 0 : index
    %43 = vector.load %arg1[%c0_45, %c0_46, %c37, %c0_47] : memref<1x1x332x8xf32, #tpu.memory_space<vmem>>, vector<1x1x288x8xf32>
    %44 = vector.shape_cast %43 : vector<1x1x288x8xf32> to vector<288x8xf32>
    %c7 = arith.constant 7 : index
    %c0_48 = arith.constant 0 : index
    %c0_49 = arith.constant 0 : index
    %45 = vector.load %arg2[%c7, %c0_48, %c0_49] : memref<9x8x128xf32, #tpu.memory_space<vmem>>, vector<1x8x128xf32>
    %46 = vector.shape_cast %45 : vector<1x8x128xf32> to vector<8x128xf32>
    %cst_50 = arith.constant dense<0.000000e+00> : vector<288x128xf32>
    %47 = tpu.matmul %44, %46, %cst_50 {dimension_numbers = #tpu.dot_dimension_numbers<[1], [0], [0], [1], [0, 0, 1, 1], [], []>} : vector<288x8xf32>, vector<8x128xf32>, vector<288x128xf32> -> vector<288x128xf32>
    %48 = arith.addf %42, %47 : vector<288x128xf32>
    %c0_51 = arith.constant 0 : index
    %c0_52 = arith.constant 0 : index
    %c38 = arith.constant 38 : index
    %c0_53 = arith.constant 0 : index
    %49 = vector.load %arg1[%c0_51, %c0_52, %c38, %c0_53] : memref<1x1x332x8xf32, #tpu.memory_space<vmem>>, vector<1x1x288x8xf32>
    %50 = vector.shape_cast %49 : vector<1x1x288x8xf32> to vector<288x8xf32>
    %c8 = arith.constant 8 : index
    %c0_54 = arith.constant 0 : index
    %c0_55 = arith.constant 0 : index
    %51 = vector.load %arg2[%c8, %c0_54, %c0_55] : memref<9x8x128xf32, #tpu.memory_space<vmem>>, vector<1x8x128xf32>
    %52 = vector.shape_cast %51 : vector<1x8x128xf32> to vector<8x128xf32>
    %cst_56 = arith.constant dense<0.000000e+00> : vector<288x128xf32>
    %53 = tpu.matmul %50, %52, %cst_56 {dimension_numbers = #tpu.dot_dimension_numbers<[1], [0], [0], [1], [0, 0, 1, 1], [], []>} : vector<288x8xf32>, vector<8x128xf32>, vector<288x128xf32> -> vector<288x128xf32>
    %54 = arith.addf %48, %53 : vector<288x128xf32>
    %c0_57 = arith.constant 0 : index
    %c0_58 = arith.constant 0 : index
    %55 = vector.load %arg3[%c0_57, %c0_58] : memref<1x128xf32, #tpu.memory_space<vmem>>, vector<1x128xf32>
    %56 = vector.broadcast %55 : vector<1x128xf32> to vector<288x128xf32>
    %57 = arith.addf %54, %56 : vector<288x128xf32>
    %cst_59 = arith.constant 0.000000e+00 : f32
    %58 = vector.broadcast %cst_59 : f32 to vector<288x128xf32>
    %59 = arith.cmpf oge, %57, %58 : vector<288x128xf32>
    %cst_60 = arith.constant 2.000000e-01 : f32
    %60 = vector.broadcast %cst_60 : f32 to vector<288x128xf32>
    %61 = arith.mulf %60, %57 : vector<288x128xf32>
    %62 = arith.select %59, %57, %61 : vector<288x128xi1>, vector<288x128xf32>
    %c0_61 = arith.constant 0 : index
    %c0_62 = arith.constant 0 : index
    %c0_63 = arith.constant 0 : index
    %63 = vector.load %arg4[%c0_61, %c0_62, %c0_63] : memref<1x288x128xf32, #tpu.memory_space<vmem>>, vector<1x288x128xf32>
    %64 = vector.shape_cast %63 : vector<1x288x128xf32> to vector<288x128xf32>
    %65 = vector.shape_cast %62 : vector<288x128xf32> to vector<1x288x128xf32>
    tpu.vector_store %arg4[%c0_61, %c0_62, %c0_63], %65 {strides = array<i32>} : memref<1x288x128xf32, #tpu.memory_space<vmem>>, vector<1x288x128xf32>,
    return
  }
  func.func @transform_0(%arg0: i32) -> (i32, i32, i32, i32) {
    %c0_i32 = arith.constant 0 : i32
    %c0_i32_0 = arith.constant 0 : i32
    %c0_i32_1 = arith.constant 0 : i32
    %c0_i32_2 = arith.constant 0 : i32
    return %arg0, %c0_i32, %c0_i32_0, %c0_i32_1 : i32, i32, i32, i32
  }
  func.func @transform_1(%arg0: i32) -> (i32, i32, i32) {
    %c0_i32 = arith.constant 0 : i32
    %c0_i32_0 = arith.constant 0 : i32
    %c0_i32_1 = arith.constant 0 : i32
    %c0_i32_2 = arith.constant 0 : i32
    return %c0_i32, %c0_i32_0, %c0_i32_1 : i32, i32, i32
  }
  func.func @transform_2(%arg0: i32) -> (i32, i32) {
    %c0_i32 = arith.constant 0 : i32
    %c0_i32_0 = arith.constant 0 : i32
    %c0_i32_1 = arith.constant 0 : i32
    return %c0_i32, %c0_i32_0 : i32, i32
  }
  func.func @transform_3(%arg0: i32) -> (i32, i32, i32) {
    %c0_i32 = arith.constant 0 : i32
    %c0_i32_0 = arith.constant 0 : i32
    %c0_i32_1 = arith.constant 0 : i32
    return %arg0, %c0_i32, %c0_i32_0 : i32, i32, i32
  }
}

</mosaic_0001>

<bundles_post_ra>
// kernel: tpu_custom_call.1
= control target key start
LH: loop header
LB: loop body
LE: loop exit
PB: predicated region body
PF: predicated region fallthrough
CT: control target
= control target key end

     0   :  { %8 = vsyncpa [#allocation3], 0  ;;  %s6926_s0 = inlined_call_operand.vmem [shape: f32[2,1,332,8], index: 0, kind: input, shape index: {}]   ;;  %s6927_s1 = inlined_call_operand.vmem [shape: f32[9,8,128], index: 1, kind: input, shape index: {}]   ;;  %s6928_s2 = inlined_call_operand.vmem [shape: f32[1,128], index: 2, kind: input, shape index: {}]   ;;  %s6929_s3 = inlined_call_operand.hbm [shape: f32[2,288,128], index: 3, kind: output, shape index: {}]  }
   0x1   :  { %10 = vsyncpa [#allocation3 + $0x1], 0  ;;  %s5802_s12 = smov 0   ;;  %s5804_s13 = smov 0  }
   0x2   :  { %s5806_s14 = smov 0   ;;  %s5808_s15 = smov 0  }
   0x3 LB: > { %s5823_s16 = sadd.s32 4294967295, %s5777_s15   ;;  %s4203_s17 = sadd.s32 4294967294, %s5777_s15   ;;  %s5777_s15 = sphi %s5808_s15, %s6935_s15   ;;  %s5773_s14 = sphi %s5806_s14, %s6934_s14   ;;  %s5769_s13 = sphi %s5804_s13, %s6933_s13   ;;  %s5765_s12 = sphi %s5802_s12, %s6932_s12  }
   0x4   : > { %s5827_s18 = sadd.s32 1, %s5777_s15   ;;  %s91_s19 = sadd.s32 1, %s5773_s14 }
   0x5   : > { %s88_s20 = ssub.s32 %s5777_s15, %s5827_s18  ;;  %p101_p0 = scmp.ne.s32.totalorder %s5773_s14, %s5769_s13 }
   0x6   : > { %p89_p1 = scmp.eq.s32.totalorder %s88_s20, 0  ;;  %p102_p2 = scmp.eq.s32.totalorder %s5823_s16, 1 }
   0x7   : > { %p107_p3 = scmp.ne.s32.totalorder %s5769_s13, %s5765_s12  ;;  %p108_p4 = scmp.eq.s32.totalorder %s4203_s17, 1 }
   0x8   : > { %s5838_s21 = scalar_select %p89_p1, %s5773_s14, %s91_s19  }
   0x9   : > { %p5840_p5 = por %p102_p2, %p101_p0  ;;  %p5844_p6 = por %p108_p4, %p107_p3 }
   0xa   : > { %p4206_p7 = scmp.ge.s32.totalorder %s5777_s15, 1  ;;  %p140_p8 = scmp.lt.s32.totalorder %s5777_s15, 3 }
   0xc   : > { %p141_p9 = pnand %p4206_p7, %p140_p8 }
   0xd   : > { %v4208_v0 = vld [vmem:[%s6927_s1 + $0x8] sm:$0xff] (!%p141_p9)  ;;  %v5856_v1 = vld [vmem:[%s6927_s1 + $0x20] sm:$0xff] (!%p141_p9)  ;;  %p164_p10 = scmp.lt.s32.totalorder (!%p141_p9), %s5823_s16, 1  ;;  %vm244_vm0 = vcmask (!%p141_p9), 64512   ;;  %v5886_v10 = vld [vmem:[%s6927_s1 + $0x30] sm:$0xff] (!%p141_p9)  ;;  %s161_s29 = sand.u32 (!%p141_p9), 1, %s5769_s13  }
   0xe   : > { %144 = sbr.rel (%p141_p9) target bundleno = 583 (0x247), region = 32  ;;  %v205_v2 = vld [vmem:[%s6927_s1] sm:$0xff] (!%p141_p9)  ;;  %4877 = vmatprep.subr.mxu1 (!%p141_p9), %v4208_v0  ;;  %5101 = vmatprep.subr.mxu0 (!%p141_p9), %v5856_v1  ;;  %v4392_v3 = vld [vmem:[%s6927_s1 + $0x28] sm:$0xff] (!%p141_p9)  ;;  %v5891_v11 = vld [vmem:[%s6927_s1 + $0x10] sm:$0xff] (!%p141_p9)  ;;  %s6885_s11 = scalar_lea.sflag (!%p141_p9), [#allocation3], %s161_s29 }
   0xf   : > { %4878 = vmatpush3.msra.mxu1 (!%p141_p9), %v4208_v0  ;;  %5102 = vmatpush3.msra.mxu0 (!%p141_p9), %v5856_v1  ;;  %v5970_v48 = vld [vmem:[%s6927_s1 + $0x38] sm:$0xff] (!%p141_p9)  ;;  %s5673_s7 = smul.u32 (!%p141_p9), 4608, %s5823_s16  ;;  %s5779_s19 = smov (!%p141_p9), [#allocation2]  }
  0x10   : > { %4933 = vmatprep.subr.mxu1 (!%p141_p9), %v205_v2  ;;  %5157 = vmatprep.subr.mxu0 (!%p141_p9), %v4392_v3  ;;  %s5719_s20 = sshll.u32 (!%p141_p9), %s5779_s19, 4  ;;  %s5720_s20 = int_to_ptr.vmem [resolvable:$false] %s5719_s20 }
  0x11   : > { %s5721_s24 = scalar_lea.vmem (!%p141_p9), %s5720_s20, 9216 }
  0x15   : > { %s165_s5 = scalar_select %p164_p10, %s5823_s16, 1 }
  0x16   : > { %s6877_s16 = scalar_lea.hbm %s6929_s3, %s5673_s7 }
  0x17   : > { %s5672_s6 = smul.u32 336, %s165_s5 }
  0x18   : > { %s5671_s5 = smul.u32 288, %s161_s29 }
  0x19   : > { %s5871_s9 = scalar_lea.vmem %s6926_s0, %s5672_s6 }
  0x1a   : > { %v206_v4 = vld [vmem:[%s5871_s9 + $0x1] sm:$0xff]  ;;  %v1805_v5 = vld [vmem:[%s5871_s9 + $0x13] sm:$0xff]  ;;  %v207_v6 = vld [vmem:[%s5871_s9 + $0x9] sm:$0xff]  ;;  %s6793_s6 = scalar_lea.vmem [#allocation2], %s5671_s5 }
  0x1b   : > { %4879 = vmatprep.mubr.msk.f32.mxu1 %vm244_vm0, %v206_v4  ;;  %5103 = vmatprep.mubr.msk.f32.mxu0 %vm244_vm0, %v1805_v5  ;;  %v1806_v7 = vld [vmem:[%s5871_s9 + $0x1b] sm:$0xff]  ;;  %v208_v8 = vld [vmem:[%s5871_s9 + $0x11] sm:$0xff]  ;;  %v1807_v9 = vld [vmem:[%s5871_s9 + $0x23] sm:$0xff]  ;;  %s4141_s8 = sshll.u32 %s6793_s6, 4  ;;  %s6879_s8 = int_to_ptr.vmem [resolvable:$true] %s4141_s8 }
  0x1c   : > { %4880 = vmatmul.mubr.msk.f32.vlgmr.msra.gmra.mrb[0].mxu1 %vm244_vm0, %v207_v6  ;;  %5104 = vmatmul.mubr.msk.f32.vlgmr.msra.gmra.mrb[0].mxu0 %vm244_vm0, %v1806_v7  ;;  %v209_v12 = vld [vmem:[%s5871_s9 + $0x19] sm:$0xff]  ;;  %v1808_v13 = vld [vmem:[%s5871_s9 + $0x2b] sm:$0xff]  ;;  %v210_v14 = vld [vmem:[%s5871_s9 + $0x21] sm:$0xff]  ;;  %s5715_s17 = scalar_lea.vmem %s6879_s8, 4608  ;;  %p5722_p0 = scmp.lt.s32.totalorder %s6879_s8, %s5720_s20 }
  0x1d   : > { %4934 = vmatpush3.msra.mxu1 %v205_v2  ;;  %5158 = vmatpush3.msra.mxu0 %v4392_v3  ;;  %v1809_v15 = vld [vmem:[%s5871_s9 + $0x33] sm:$0xff]  ;;  %v211_v16 = vld [vmem:[%s5871_s9 + $0x29] sm:$0xff]  ;;  %v1810_v17 = vld [vmem:[%s5871_s9 + $0x3b] sm:$0xff]  ;;  %p5716_p11 = scmp.ne.s32.totalorder %s6879_s8, %s5715_s17  ;;  %p5723_p1 = scmp.lt.s32.totalorder %s5721_s24, %s5715_s17 }
  0x1e   : > { %4882 = vmatprep.mubr.msk.f32.mxu1 %vm244_vm0, %v208_v8  ;;  %5106 = vmatprep.mubr.msk.f32.mxu0 %vm244_vm0, %v1807_v9  ;;  %v212_v18 = vld [vmem:[%s5871_s9 + $0x31] sm:$0xff]  ;;  %v1811_v19 = vld [vmem:[%s5871_s9 + $0x43] sm:$0xff]  ;;  %v213_v20 = vld [vmem:[%s5871_s9 + $0x39] sm:$0xff] }
  0x1f   : > { %5213 = vmatprep.subr.mxu0 %v5886_v10  ;;  %4989 = vmatprep.subr.mxu1 %v5891_v11  ;;  %v1812_v21 = vld [vmem:[%s5871_s9 + $0x4b] sm:$0xff]  ;;  %v214_v22 = vld [vmem:[%s5871_s9 + $0x41] sm:$0xff]  ;;  %v1813_v23 = vld [vmem:[%s5871_s9 + $0x53] sm:$0xff]  ;;  %p5717_p12 = pnand %p5716_p11, %p5840_p5  ;;  %p5724_p2 = por %p5723_p1, %p5722_p0 }
  0x20   : > { %4883 = vmatmul.mubr.msk.f32.gmra.mrb[2].mxu1 %vm244_vm0, %v209_v12  ;;  %5107 = vmatmul.mubr.msk.f32.gmra.mrb[2].mxu0 %vm244_vm0, %v1808_v13  ;;  %v215_v24 = vld [vmem:[%s5871_s9 + $0x49] sm:$0xff]  ;;  %v1814_v25 = vld [vmem:[%s5871_s9 + $0x5b] sm:$0xff]  ;;  %v216_v26 = vld [vmem:[%s5871_s9 + $0x51] sm:$0xff] }
  0x21   : > { %4885 = vmatprep.mubr.msk.f32.mxu1 %vm244_vm0, %v210_v14  ;;  %5109 = vmatprep.mubr.msk.f32.mxu0 %vm244_vm0, %v1809_v15  ;;  %v1815_v27 = vld [vmem:[%s5871_s9 + $0x63] sm:$0xff]  ;;  %v217_v28 = vld [vmem:[%s5871_s9 + $0x59] sm:$0xff]  ;;  %v1816_v29 = vld [vmem:[%s5871_s9 + $0x6b] sm:$0xff]  ;;  %p5718_p13 = pneg %p5717_p12 }
  0x22   : > { %v218_v30 = vld [vmem:[%s5871_s9 + $0x61] sm:$0xff]  ;;  %v1817_v31 = vld [vmem:[%s5871_s9 + $0x73] sm:$0xff]  ;;  %v219_v32 = vld [vmem:[%s5871_s9 + $0x69] sm:$0xff] }
  0x23   : > { %v1818_v33 = vld [vmem:[%s5871_s9 + $0x7b] sm:$0xff]  ;;  %v220_v34 = vld [vmem:[%s5871_s9 + $0x71] sm:$0xff]  ;;  %v1819_v35 = vld [vmem:[%s5871_s9 + $0x83] sm:$0xff]  ;;  %p5725_p3 = pnand %p5724_p2, %p5718_p13 }
  0x24   : > { %4886 = vmatmul.mubr.msk.f32.gmra.mrb[4].mxu1 %vm244_vm0, %v211_v16  ;;  %5110 = vmatmul.mubr.msk.f32.gmra.mrb[4].mxu0 %vm244_vm0, %v1810_v17  ;;  %v221_v36 = vld [vmem:[%s5871_s9 + $0x79] sm:$0xff]  ;;  %v1820_v37 = vld [vmem:[%s5871_s9 + $0x8b] sm:$0xff]  ;;  %v222_v38 = vld [vmem:[%s5871_s9 + $0x81] sm:$0xff] }
  0x25   : > { %4888 = vmatprep.mubr.msk.f32.mxu1 %vm244_vm0, %v212_v18  ;;  %5112 = vmatprep.mubr.msk.f32.mxu0 %vm244_vm0, %v1811_v19  ;;  %v1821_v39 = vld [vmem:[%s5871_s9 + $0x93] sm:$0xff]  ;;  %v223_v40 = vld [vmem:[%s5871_s9 + $0x89] sm:$0xff]  ;;  %v1822_v41 = vld [vmem:[%s5871_s9 + $0x9b] sm:$0xff] }
  0x26   : > { %v224_v42 = vld [vmem:[%s5871_s9 + $0x91] sm:$0xff]  ;;  %v225_v44 = vld [vmem:[%s5871_s9 + $0x99] sm:$0xff]  ;;  %v226_v46 = vld [vmem:[%s5871_s9 + $0xa1] sm:$0xff] }
  0x27   : > { %v2232_v43 = vld [vmem:[%s5871_s9 + $0x14] sm:$0xff]  ;;  %v2233_v45 = vld [vmem:[%s5871_s9 + $0x1c] sm:$0xff]  ;;  %v5965_v47 = vld [vmem:[%s5871_s9 + $0x24] sm:$0xff] }
  0x28   : > { %4889 = vmatmul.mubr.msk.f32.gmra.mrb[6].mxu1 %vm244_vm0, %v213_v20  ;;  %5113 = vmatmul.mubr.msk.f32.gmra.mrb[6].mxu0 %vm244_vm0, %v1812_v21  ;;  %v227_v49 = vld [vmem:[%s5871_s9 + $0xa9] sm:$0xff]  ;;  %v228_v51 = vld [vmem:[%s5871_s9 + $0xb1] sm:$0xff]  ;;  %v229_v53 = vld [vmem:[%s5871_s9 + $0xb9] sm:$0xff] }
  0x29   : > { %4891 = vmatprep.mubr.msk.f32.mxu1 %vm244_vm0, %v214_v22  ;;  %5115 = vmatprep.mubr.msk.f32.mxu0 %vm244_vm0, %v1813_v23  ;;  %v5978_v50 = vld [vmem:[%s5871_s9 + $0x2c] sm:$0xff]  ;;  %v5984_v52 = vld [vmem:[%s5871_s9 + $0x34] sm:$0xff]  ;;  %v5995_v54 = vld [vmem:[%s5871_s9 + $0x3c] sm:$0xff] }
  0x2a   : > { %v230_v55 = vld [vmem:[%s5871_s9 + $0xc1] sm:$0xff]  ;;  %v231_v57 = vld [vmem:[%s5871_s9 + $0xc9] sm:$0xff]  ;;  %v232_v59 = vld [vmem:[%s5871_s9 + $0xd1] sm:$0xff] }
  0x2b   : > { %v5999_v56 = vld [vmem:[%s5871_s9 + $0x44] sm:$0xff]  ;;  %v6009_v58 = vld [vmem:[%s5871_s9 + $0x4c] sm:$0xff]  ;;  %v6013_v60 = vld [vmem:[%s5871_s9 + $0x54] sm:$0xff] }
  0x2c   : > { %4892 = vmatmul.mubr.msk.f32.gmra.mrb[8].mxu1 %vm244_vm0, %v215_v24  ;;  %5116 = vmatmul.mubr.msk.f32.gmra.mrb[8].mxu0 %vm244_vm0, %v1814_v25  ;;  %v233_v61 = vld [vmem:[%s5871_s9 + $0xd9] sm:$0xff]  ;;  %v234_v63 = vld [vmem:[%s5871_s9 + $0xe1] sm:$0xff]  ;;  %v235_v2 = vld [vmem:[%s5871_s9 + $0xe9] sm:$0xff] }
  0x2d   : > { %4894 = vmatprep.mubr.msk.f32.mxu1 %vm244_vm0, %v216_v26  ;;  %5118 = vmatprep.mubr.msk.f32.mxu0 %vm244_vm0, %v1815_v27  ;;  %v6023_v62 = vld [vmem:[%s5871_s9 + $0x5c] sm:$0xff]  ;;  %v6027_v0 = vld [vmem:[%s5871_s9 + $0x64] sm:$0xff]  ;;  %v6037_v3 = vld [vmem:[%s5871_s9 + $0x6c] sm:$0xff] }
  0x2e   : > { %v236_v4 = vld [vmem:[%s5871_s9 + $0xf1] sm:$0xff]  ;;  %v237_v6 = vld [vmem:[%s5871_s9 + $0xf9] sm:$0xff]  ;;  %v238_v8 = vld [vmem:[%s5871_s9 + $0x101] sm:$0xff] }
  0x2f   : > { %v6041_v5 = vld [vmem:[%s5871_s9 + $0x74] sm:$0xff]  ;;  %v6051_v7 = vld [vmem:[%s5871_s9 + $0x7c] sm:$0xff]  ;;  %v6055_v9 = vld [vmem:[%s5871_s9 + $0x84] sm:$0xff] }
  0x30   : > { %4895 = vmatmul.mubr.msk.f32.gmra.mrb[10].mxu1 %vm244_vm0, %v217_v28  ;;  %5119 = vmatmul.mubr.msk.f32.gmra.mrb[10].mxu0 %vm244_vm0, %v1816_v29  ;;  %v6065_v12 = vld [vmem:[%s5871_s9 + $0x8c] sm:$0xff]  ;;  %v6069_v14 = vld [vmem:[%s5871_s9 + $0x94] sm:$0xff]  ;;  %v6079_v16 = vld [vmem:[%s5871_s9 + $0x9c] sm:$0xff] }
  0x31   : > { %4897 = vmatprep.mubr.msk.f32.mxu1 %vm244_vm0, %v218_v30  ;;  %5121 = vmatprep.mubr.msk.f32.mxu0 %vm244_vm0, %v1817_v31  ;;  %v240_v13 = vld [vmem:[%s5871_s9 + $0x111] sm:$0xff]  ;;  %v241_v15 = vld [vmem:[%s5871_s9 + $0x119] sm:$0xff]  ;;  %v6083_v18 = vld [vmem:[%s5871_s9 + $0xa4] sm:$0xff] }
  0x32   : > { %v169_v17 = vld [vmem:[%s5871_s9] sm:$0xff]  ;;  %v170_v19 = vld [vmem:[%s5871_s9 + $0x8] sm:$0xff]  ;;  %v171_v21 = vld [vmem:[%s5871_s9 + $0x10] sm:$0xff] }
  0x33   : > { %v6093_v20 = vld [vmem:[%s5871_s9 + $0xac] sm:$0xff]  ;;  %v6097_v22 = vld [vmem:[%s5871_s9 + $0xb4] sm:$0xff]  ;;  %v6111_v25 = vld [vmem:[%s5871_s9 + $0xbc] sm:$0xff] }
  0x34   : > { %4898 = vmatmul.mubr.msk.f32.gmra.mrb[12].mxu1 %vm244_vm0, %v219_v32  ;;  %5122 = vmatmul.mubr.msk.f32.gmra.mrb[12].mxu0 %vm244_vm0, %v1818_v33  ;;  %v6102_v23 = vld [vmem:[%s6927_s1 + $0x18] sm:$0xff]  ;;  %v173_v26 = vld [vmem:[%s5871_s9 + $0x20] sm:$0xff]  ;;  %v6128_v28 = vld [vmem:[%s5871_s9 + $0xcc] sm:$0xff] }
  0x35   : > { %4900 = vmatprep.mubr.msk.f32.mxu1 %vm244_vm0, %v220_v34  ;;  %5124 = vmatprep.mubr.msk.f32.mxu0 %vm244_vm0, %v1819_v35  ;;  %v172_v24 = vld [vmem:[%s5871_s9 + $0x18] sm:$0xff]  ;;  %v6117_v27 = vld [vmem:[%s5871_s9 + $0xc4] sm:$0xff]  ;;  %v175_v29 = vld [vmem:[%s5871_s9 + $0x30] sm:$0xff] }
  0x36   : > { %v6132_v30 = vld [vmem:[%s5871_s9 + $0xd4] sm:$0xff]  ;;  %v6142_v32 = vld [vmem:[%s5871_s9 + $0xdc] sm:$0xff]  ;;  %v6146_v34 = vld [vmem:[%s5871_s9 + $0xe4] sm:$0xff] }
  0x37   : > { %v176_v31 = vld [vmem:[%s5871_s9 + $0x38] sm:$0xff]  ;;  %v177_v33 = vld [vmem:[%s5871_s9 + $0x40] sm:$0xff]  ;;  %v178_v35 = vld [vmem:[%s5871_s9 + $0x48] sm:$0xff] }
  0x38   : > { %4901 = vmatmul.mubr.msk.f32.gmra.mrb[14].mxu1 %vm244_vm0, %v221_v36  ;;  %5125 = vmatmul.mubr.msk.f32.gmra.mrb[14].mxu0 %vm244_vm0, %v1820_v37  ;;  %v6156_v36 = vld [vmem:[%s5871_s9 + $0xec] sm:$0xff] }
  0x39   : > { %4903 = vmatprep.mubr.msk.f32.mxu1 %vm244_vm0, %v222_v38  ;;  %5127 = vmatprep.mubr.msk.f32.mxu0 %vm244_vm0, %v1821_v39  ;;  %v179_v37 = vld [vmem:[%s5871_s9 + $0x50] sm:$0xff]  ;;  %v180_v39 = vld [vmem:[%s5871_s9 + $0x58] sm:$0xff] }
  0x3a   : > { %v6160_v38 = vld [vmem:[%s5871_s9 + $0xf4] sm:$0xff] }
  0x3c   : > { %4904 = vmatmul.mubr.msk.f32.gmra.mrb[16].mxu1 %vm244_vm0, %v223_v40  ;;  %5128 = vmatmul.mubr.msk.f32.gmra.mrb[16].mxu0 %vm244_vm0, %v1822_v41  ;;  %v6170_v40 = vld [vmem:[%s5871_s9 + $0xfc] sm:$0xff] }
  0x3d   : > { %4906 = vmatprep.mubr.msk.f32.mxu1 %vm244_vm0, %v224_v42  ;;  %5159 = vmatprep.mubr.msk.f32.mxu0 %vm244_vm0, %v2232_v43  ;;  %v181_v41 = vld [vmem:[%s5871_s9 + $0x60] sm:$0xff]  ;;  %v182_v43 = vld [vmem:[%s5871_s9 + $0x68] sm:$0xff] }
  0x3e   : > { %v6174_v42 = vld [vmem:[%s5871_s9 + $0x104] sm:$0xff] }
  0x40   : > { %4907 = vmatmul.mubr.msk.f32.gmra.mrb[18].mxu1 %vm244_vm0, %v225_v44  ;;  %5160 = vmatmul.mubr.msk.f32.vlgmr.msra.gmra.mrb[0].mxu0 %vm244_vm0, %v2233_v45  ;;  %v6184_v44 = vld [vmem:[%s5871_s9 + $0x10c] sm:$0xff] }
  0x41   : > { %5214 = vmatpush3.msra.mxu0 %v5886_v10  ;;  %4909 = vmatprep.mubr.msk.f32.mxu1 %vm244_vm0, %v226_v46  ;;  %v239_v10 = vld [vmem:[%s5871_s9 + $0x109] sm:$0xff]  ;;  %v6188_v46 = vld [vmem:[%s5871_s9 + $0x114] sm:$0xff] }
  0x42   : > { %5162 = vmatprep.mubr.msk.f32.mxu0 %vm244_vm0, %v5965_v47  ;;  %5269 = vmatprep.subr.mxu0 %v5970_v48  ;;  %v183_v45 = vld [vmem:[%s5871_s9 + $0x70] sm:$0xff] }
  0x44   : > { %4910 = vmatmul.mubr.msk.f32.gmra.mrb[20].mxu1 %vm244_vm0, %v227_v49  ;;  %5163 = vmatmul.mubr.msk.f32.gmra.mrb[2].mxu0 %vm244_vm0, %v5978_v50  ;;  %v184_v49 = vld [vmem:[%s5871_s9 + $0x78] sm:$0xff] }
  0x45   : > { %4912 = vmatprep.mubr.msk.f32.mxu1 %vm244_vm0, %v228_v51  ;;  %5165 = vmatprep.mubr.msk.f32.mxu0 %vm244_vm0, %v5984_v52  ;;  %v6198_v51 = vld [vmem:[%s5871_s9 + $0x11c] sm:$0xff] }
  0x48   : > { %4913 = vmatmul.mubr.msk.f32.gmra.mrb[22].mxu1 %vm244_vm0, %v229_v53  ;;  %5166 = vmatmul.mubr.msk.f32.gmra.mrb[4].mxu0 %vm244_vm0, %v5995_v54  ;;  %v185_v53 = vld [vmem:[%s5871_s9 + $0x80] sm:$0xff] }
  0x49   : > { %4915 = vmatprep.mubr.msk.f32.mxu1 %vm244_vm0, %v230_v55  ;;  %5168 = vmatprep.mubr.msk.f32.mxu0 %vm244_vm0, %v5999_v56  ;;  %v6202_v55 = vld [vmem:[%s5871_s9 + $0x124] sm:$0xff] }
  0x4c   : > { %4916 = vmatmul.mubr.msk.f32.gmra.mrb[24].mxu1 %vm244_vm0, %v231_v57  ;;  %5169 = vmatmul.mubr.msk.f32.gmra.mrb[6].mxu0 %vm244_vm0, %v6009_v58  ;;  %v186_v57 = vld [vmem:[%s5871_s9 + $0x88] sm:$0xff] }
  0x4d   : > { %4918 = vmatprep.mubr.msk.f32.mxu1 %vm244_vm0, %v232_v59  ;;  %5171 = vmatprep.mubr.msk.f32.mxu0 %vm244_vm0, %v6013_v60  ;;  %v6212_v59 = vld [vmem:[%s5871_s9 + $0x12c] sm:$0xff] }
  0x50   : > { %4919 = vmatmul.mubr.msk.f32.gmra.mrb[26].mxu1 %vm244_vm0, %v233_v61  ;;  %5172 = vmatmul.mubr.msk.f32.gmra.mrb[8].mxu0 %vm244_vm0, %v6023_v62  ;;  %v187_v61 = vld [vmem:[%s5871_s9 + $0x90] sm:$0xff] }
  0x51   : > { %4921 = vmatprep.mubr.msk.f32.mxu1 %vm244_vm0, %v234_v63  ;;  %5174 = vmatprep.mubr.msk.f32.mxu0 %vm244_vm0, %v6027_v0  ;;  %v188_v63 = vld [vmem:[%s5871_s9 + $0x98] sm:$0xff] }
  0x54   : > { %4922 = vmatmul.mubr.msk.f32.gmra.mrb[28].mxu1 %vm244_vm0, %v235_v2  ;;  %5175 = vmatmul.mubr.msk.f32.gmra.mrb[10].mxu0 %vm244_vm0, %v6037_v3  ;;  %v189_v2 = vld [vmem:[%s5871_s9 + $0xa0] sm:$0xff] }
  0x55   : > { %4924 = vmatprep.mubr.msk.f32.mxu1 %vm244_vm0, %v236_v4  ;;  %5177 = vmatprep.mubr.msk.f32.mxu0 %vm244_vm0, %v6041_v5  ;;  %v6226_v4 = vld [vmem:[%s6927_s1 + $0x40] sm:$0xff] }
  0x58   : > { %4925 = vmatmul.mubr.msk.f32.gmra.mrb[30].mxu1 %vm244_vm0, %v237_v6  ;;  %5178 = vmatmul.mubr.msk.f32.gmra.mrb[12].mxu0 %vm244_vm0, %v6051_v7  ;;  %v191_v6 = vld [vmem:[%s5871_s9 + $0xb0] sm:$0xff] }
  0x59   : > { %4927 = vmatprep.mubr.msk.f32.mxu1 %vm244_vm0, %v238_v8  ;;  %5180 = vmatprep.mubr.msk.f32.mxu0 %vm244_vm0, %v6055_v9  ;;  %v204_v8 = vld [vmem:[%s5871_s9 + $0x118] sm:$0xff] }
  0x5c   : > { %4928 = vmatmul.mubr.msk.f32.gmra.mrb[32].mxu1 %vm244_vm0, %v239_v10  ;;  %5181 = vmatmul.mubr.msk.f32.gmra.mrb[14].mxu0 %vm244_vm0, %v6065_v12  ;;  %v952_v10 = vld [vmem:[%s5871_s9 + $0xa] sm:$0xff] }
  0x5d   : > { %4930 = vmatprep.mubr.msk.f32.mxu1 %vm244_vm0, %v240_v13  ;;  %5183 = vmatprep.mubr.msk.f32.mxu0 %vm244_vm0, %v6069_v14  ;;  %v6311_v13 = vld [vmem:[%s5871_s9 + $0x1a] sm:$0xff] }
  0x60   : > { %4931 = vmatmul.mubr.msk.f32.gmra.mrb[34].mxu1 %vm244_vm0, %v241_v15  ;;  %5184 = vmatmul.mubr.msk.f32.gmra.mrb[16].mxu0 %vm244_vm0, %v6079_v16  ;;  %v6328_v15 = vld [vmem:[%s5871_s9 + $0x2a] sm:$0xff] }
  0x61   : > { %4935 = vmatprep.mubr.msk.f32.mxu1 %vm244_vm0, %v169_v17  ;;  %5186 = vmatprep.mubr.msk.f32.mxu0 %vm244_vm0, %v6083_v18  ;;  %v6342_v17 = vld [vmem:[%s5871_s9 + $0x3a] sm:$0xff] }
  0x64   : > { %4936 = vmatmul.mubr.msk.f32.vlgmr.msra.gmra.mrb[0].mxu1 %vm244_vm0, %v170_v19  ;;  %5187 = vmatmul.mubr.msk.f32.gmra.mrb[18].mxu0 %vm244_vm0, %v6093_v20  ;;  %v6356_v19 = vld [vmem:[%s5871_s9 + $0x4a] sm:$0xff] }
  0x65   : > { %4990 = vmatpush3.msra.mxu1 %v5891_v11  ;;  %4938 = vmatprep.mubr.msk.f32.mxu1 %vm244_vm0, %v171_v21  ;;  %v174_v11 = vld [vmem:[%s5871_s9 + $0x28] sm:$0xff]  ;;  %v6370_v21 = vld [vmem:[%s5871_s9 + $0x5a] sm:$0xff] }
  0x66   : > { %5189 = vmatprep.mubr.msk.f32.mxu0 %vm244_vm0, %v6097_v22  ;;  %5045 = vmatprep.subr.mxu1 %v6102_v23 }
  0x68   : > { %4939 = vmatmul.mubr.msk.f32.gmra.mrb[2].mxu1 %vm244_vm0, %v172_v24  ;;  %5190 = vmatmul.mubr.msk.f32.gmra.mrb[20].mxu0 %vm244_vm0, %v6111_v25  ;;  %v6387_v24 = vld [vmem:[%s5871_s9 + $0x72] sm:$0xff] }
  0x69   : > { %4941 = vmatprep.mubr.msk.f32.mxu1 %vm244_vm0, %v173_v26  ;;  %5192 = vmatprep.mubr.msk.f32.mxu0 %vm244_vm0, %v6117_v27  ;;  %v6401_v26 = vld [vmem:[%s5871_s9 + $0x82] sm:$0xff] }
  0x6c   : > { %4942 = vmatmul.mubr.msk.f32.gmra.mrb[4].mxu1 %vm244_vm0, %v174_v11  ;;  %5193 = vmatmul.mubr.msk.f32.gmra.mrb[22].mxu0 %vm244_vm0, %v6128_v28  ;;  %v6412_v11 = vld [vmem:[%s5871_s9 + $0x8a] sm:$0xff] }
  0x6d   : > { %4944 = vmatprep.mubr.msk.f32.mxu1 %vm244_vm0, %v175_v29  ;;  %5195 = vmatprep.mubr.msk.f32.mxu0 %vm244_vm0, %v6132_v30  ;;  %v6416_v29 = vld [vmem:[%s5871_s9 + $0x92] sm:$0xff] }
  0x70   : > { %4945 = vmatmul.mubr.msk.f32.gmra.mrb[6].mxu1 %vm244_vm0, %v176_v31  ;;  %5196 = vmatmul.mubr.msk.f32.gmra.mrb[24].mxu0 %vm244_vm0, %v6142_v32  ;;  %v6426_v31 = vld [vmem:[%s5871_s9 + $0x9a] sm:$0xff] }
  0x71   : > { %4947 = vmatprep.mubr.msk.f32.mxu1 %vm244_vm0, %v177_v33  ;;  %5198 = vmatprep.mubr.msk.f32.mxu0 %vm244_vm0, %v6146_v34  ;;  %v6430_v33 = vld [vmem:[%s5871_s9 + $0xa2] sm:$0xff] }
  0x74   : > { %4948 = vmatmul.mubr.msk.f32.gmra.mrb[8].mxu1 %vm244_vm0, %v178_v35  ;;  %5199 = vmatmul.mubr.msk.f32.gmra.mrb[26].mxu0 %vm244_vm0, %v6156_v36  ;;  %v6440_v35 = vld [vmem:[%s5871_s9 + $0xaa] sm:$0xff] }
  0x75   : > { %4950 = vmatprep.mubr.msk.f32.mxu1 %vm244_vm0, %v179_v37  ;;  %5201 = vmatprep.mubr.msk.f32.mxu0 %vm244_vm0, %v6160_v38  ;;  %v6445_v37 = vld [vmem:[%s5871_s9 + $0xb2] sm:$0xff] }
  0x78   : > { %4951 = vmatmul.mubr.msk.f32.gmra.mrb[10].mxu1 %vm244_vm0, %v180_v39  ;;  %5202 = vmatmul.mubr.msk.f32.gmra.mrb[28].mxu0 %vm244_vm0, %v6170_v40  ;;  %v6455_v39 = vld [vmem:[%s5871_s9 + $0xba] sm:$0xff] }
  0x79   : > { %4953 = vmatprep.mubr.msk.f32.mxu1 %vm244_vm0, %v181_v41  ;;  %5204 = vmatprep.mubr.msk.f32.mxu0 %vm244_vm0, %v6174_v42  ;;  %v6459_v41 = vld [vmem:[%s5871_s9 + $0xc2] sm:$0xff] }
  0x7c   : > { %4954 = vmatmul.mubr.msk.f32.gmra.mrb[12].mxu1 %vm244_vm0, %v182_v43  ;;  %5205 = vmatmul.mubr.msk.f32.gmra.mrb[30].mxu0 %vm244_vm0, %v6184_v44  ;;  %v6469_v43 = vld [vmem:[%s5871_s9 + $0xca] sm:$0xff] }
  0x7d   : > { %4956 = vmatprep.mubr.msk.f32.mxu1 %vm244_vm0, %v183_v45  ;;  %5207 = vmatprep.mubr.msk.f32.mxu0 %vm244_vm0, %v6188_v46  ;;  %v6473_v45 = vld [vmem:[%s5871_s9 + $0xd2] sm:$0xff] }
  0x80   : > { %4957 = vmatmul.mubr.msk.f32.gmra.mrb[14].mxu1 %vm244_vm0, %v184_v49  ;;  %5208 = vmatmul.mubr.msk.f32.gmra.mrb[32].mxu0 %vm244_vm0, %v6198_v51  ;;  %v6483_v49 = vld [vmem:[%s5871_s9 + $0xda] sm:$0xff] }
  0x81   : > { %4959 = vmatprep.mubr.msk.f32.mxu1 %vm244_vm0, %v185_v53  ;;  %5210 = vmatprep.mubr.msk.f32.mxu0 %vm244_vm0, %v6202_v55  ;;  %v6487_v53 = vld [vmem:[%s5871_s9 + $0xe2] sm:$0xff] }
  0x84   : > { %4960 = vmatmul.mubr.msk.f32.gmra.mrb[16].mxu1 %vm244_vm0, %v186_v57  ;;  %5211 = vmatmul.mubr.msk.f32.gmra.mrb[34].mxu0 %vm244_vm0, %v6212_v59  ;;  %v6497_v57 = vld [vmem:[%s5871_s9 + $0xea] sm:$0xff] }
  0x85   : > { %4962 = vmatprep.mubr.msk.f32.mxu1 %vm244_vm0, %v187_v61  ;;  %5215 = vmatprep.mubr.msk.f32.mxu0 %vm244_vm0, %v5965_v47  ;;  %v190_v47 = vld [vmem:[%s5871_s9 + $0xa8] sm:$0xff]  ;;  %v6501_v61 = vld [vmem:[%s5871_s9 + $0xf2] sm:$0xff] }
  0x88   : > { %4963 = vmatmul.mubr.msk.f32.gmra.mrb[18].mxu1 %vm244_vm0, %v188_v63  ;;  %5216 = vmatmul.mubr.msk.f32.vlgmr.msra.gmra.mrb[0].mxu0 %vm244_vm0, %v5978_v50  ;;  %v193_v50 = vld [vmem:[%s5871_s9 + $0xc0] sm:$0xff] }
  0x89   : > { %5270 = vmatpush3.msra.mxu0 %v5970_v48  ;;  %4965 = vmatprep.mubr.msk.f32.mxu1 %vm244_vm0, %v189_v2  ;;  %v192_v48 = vld [vmem:[%s5871_s9 + $0xb8] sm:$0xff]  ;;  %v3098_v63 = vld [vmem:[%s5871_s9 + $0x85] sm:$0xff] }
  0x8a   : > { %5218 = vmatprep.mubr.msk.f32.mxu0 %vm244_vm0, %v5984_v52  ;;  %5325 = vmatprep.subr.mxu0 %v6226_v4  ;;  %v194_v52 = vld [vmem:[%s5871_s9 + $0xc8] sm:$0xff]  ;;  %v6511_v2 = vld [vmem:[%s5871_s9 + $0xfa] sm:$0xff] }
  0x8c   : > { %4966 = vmatmul.mubr.msk.f32.gmra.mrb[20].mxu1 %vm244_vm0, %v190_v47  ;;  %5219 = vmatmul.mubr.msk.f32.gmra.mrb[2].mxu0 %vm244_vm0, %v5995_v54  ;;  %v195_v54 = vld [vmem:[%s5871_s9 + $0xd0] sm:$0xff]  ;;  %v6515_v47 = vld [vmem:[%s5871_s9 + $0x102] sm:$0xff] }
  0x8d   : > { %4968 = vmatprep.mubr.msk.f32.mxu1 %vm244_vm0, %v191_v6  ;;  %5221 = vmatprep.mubr.msk.f32.mxu0 %vm244_vm0, %v5999_v56  ;;  %v196_v56 = vld [vmem:[%s5871_s9 + $0xd8] sm:$0xff] }
  0x8e   : > { %v3100_v6 = vld [vmem:[%s5871_s9 + $0x95] sm:$0xff] }
  0x90   : > { %4969 = vmatmul.mubr.msk.f32.gmra.mrb[22].mxu1 %vm244_vm0, %v192_v48  ;;  %5222 = vmatmul.mubr.msk.f32.gmra.mrb[4].mxu0 %vm244_vm0, %v6009_v58  ;;  %v197_v58 = vld [vmem:[%s5871_s9 + $0xe0] sm:$0xff]  ;;  %v6525_v48 = vld [vmem:[%s5871_s9 + $0x10a] sm:$0xff] }
  0x91   : > { %4971 = vmatprep.mubr.msk.f32.mxu1 %vm244_vm0, %v193_v50  ;;  %5224 = vmatprep.mubr.msk.f32.mxu0 %vm244_vm0, %v6013_v60  ;;  %v198_v60 = vld [vmem:[%s5871_s9 + $0xe8] sm:$0xff]  ;;  %v3101_v50 = vld [vmem:[%s5871_s9 + $0x9d] sm:$0xff] }
  0x94   : > { %4972 = vmatmul.mubr.msk.f32.gmra.mrb[24].mxu1 %vm244_vm0, %v194_v52  ;;  %5225 = vmatmul.mubr.msk.f32.gmra.mrb[6].mxu0 %vm244_vm0, %v6023_v62  ;;  %v199_v62 = vld [vmem:[%s5871_s9 + $0xf0] sm:$0xff] }
  0x95   : > { %4974 = vmatprep.mubr.msk.f32.mxu1 %vm244_vm0, %v195_v54  ;;  %5227 = vmatprep.mubr.msk.f32.mxu0 %vm244_vm0, %v6027_v0  ;;  %v200_v0 = vld [vmem:[%s5871_s9 + $0xf8] sm:$0xff]  ;;  %v3102_v54 = vld [vmem:[%s5871_s9 + $0xa5] sm:$0xff] }
  0x96   : > { %v6529_v52 = vld [vmem:[%s5871_s9 + $0x112] sm:$0xff] }
  0x98   : > { %4975 = vmatmul.mubr.msk.f32.gmra.mrb[26].mxu1 %vm244_vm0, %v196_v56  ;;  %5228 = vmatmul.mubr.msk.f32.gmra.mrb[8].mxu0 %vm244_vm0, %v6037_v3  ;;  %v201_v3 = vld [vmem:[%s5871_s9 + $0x100] sm:$0xff] }
  0x99   : > { %4977 = vmatprep.mubr.msk.f32.mxu1 %vm244_vm0, %v197_v58  ;;  %5230 = vmatprep.mubr.msk.f32.mxu0 %vm244_vm0, %v6041_v5  ;;  %v202_v5 = vld [vmem:[%s5871_s9 + $0x108] sm:$0xff]  ;;  %v6539_v56 = vld [vmem:[%s5871_s9 + $0x11a] sm:$0xff] }
  0x9a   : > { %v3103_v58 = vld [vmem:[%s5871_s9 + $0xad] sm:$0xff] }
  0x9c   : > { %4978 = vmatmul.mubr.msk.f32.gmra.mrb[28].mxu1 %vm244_vm0, %v198_v60  ;;  %5231 = vmatmul.mubr.msk.f32.gmra.mrb[10].mxu0 %vm244_vm0, %v6051_v7  ;;  %v203_v7 = vld [vmem:[%s5871_s9 + $0x110] sm:$0xff] }
  0x9d   : > { %4980 = vmatprep.mubr.msk.f32.mxu1 %vm244_vm0, %v199_v62  ;;  %5233 = vmatprep.mubr.msk.f32.mxu0 %vm244_vm0, %v6055_v9  ;;  %v951_v9 = vld [vmem:[%s5871_s9 + $0x2] sm:$0xff]  ;;  %v3104_v60 = vld [vmem:[%s5871_s9 + $0xb5] sm:$0xff] }
  0x9e   : > { %v3105_v62 = vld [vmem:[%s5871_s9 + $0xbd] sm:$0xff] }
  0xa0   : > { %4981 = vmatmul.mubr.msk.f32.gmra.mrb[30].mxu1 %vm244_vm0, %v200_v0  ;;  %5234 = vmatmul.mubr.msk.f32.gmra.mrb[12].mxu0 %vm244_vm0, %v6065_v12  ;;  %v6302_v12 = vld [vmem:[%s5871_s9 + $0x12] sm:$0xff]  ;;  %v3106_v0 = vld [vmem:[%s5871_s9 + $0xc5] sm:$0xff] }
  0xa1   : > { %4983 = vmatprep.mubr.msk.f32.mxu1 %vm244_vm0, %v201_v3  ;;  %5236 = vmatprep.mubr.msk.f32.mxu0 %vm244_vm0, %v6069_v14  ;;  %v6316_v14 = vld [vmem:[%s5871_s9 + $0x22] sm:$0xff]  ;;  %v3107_v3 = vld [vmem:[%s5871_s9 + $0xcd] sm:$0xff] }
  0xa4   : > { %4984 = vmatmul.mubr.msk.f32.gmra.mrb[32].mxu1 %vm244_vm0, %v202_v5  ;;  %5237 = vmatmul.mubr.msk.f32.gmra.mrb[14].mxu0 %vm244_vm0, %v6079_v16  ;;  %v6331_v16 = vld [vmem:[%s5871_s9 + $0x32] sm:$0xff] }
  0xa5   : > { %4986 = vmatprep.mubr.msk.f32.mxu1 %vm244_vm0, %v203_v7  ;;  %5239 = vmatprep.mubr.msk.f32.mxu0 %vm244_vm0, %v6083_v18  ;;  %v6345_v18 = vld [vmem:[%s5871_s9 + $0x42] sm:$0xff]  ;;  %v3108_v5 = vld [vmem:[%s5871_s9 + $0xd5] sm:$0xff] }
  0xa6   : > { %v3110_v7 = vld [vmem:[%s5871_s9 + $0xe5] sm:$0xff] }
  0xa8   : > { %4987 = vmatmul.mubr.msk.f32.gmra.mrb[34].mxu1 %vm244_vm0, %v204_v8  ;;  %5240 = vmatmul.mubr.msk.f32.gmra.mrb[16].mxu0 %vm244_vm0, %v6093_v20  ;;  %v6359_v20 = vld [vmem:[%s5871_s9 + $0x52] sm:$0xff] }
  0xa9   : > { %4991 = vmatprep.mubr.msk.f32.mxu1 %vm244_vm0, %v951_v9  ;;  %5242 = vmatprep.mubr.msk.f32.mxu0 %vm244_vm0, %v6097_v22  ;;  %v6373_v22 = vld [vmem:[%s5871_s9 + $0x62] sm:$0xff]  ;;  %v3111_v8 = vld [vmem:[%s5871_s9 + $0xed] sm:$0xff]  ;;  %v3112_v9 = vld [vmem:[%s5871_s9 + $0xf5] sm:$0xff] }
  0xac   : > { %4992 = vmatmul.mubr.msk.f32.vlgmr.msra.gmra.mrb[0].mxu1 %vm244_vm0, %v952_v10  ;;  %5243 = vmatmul.mubr.msk.f32.gmra.mrb[18].mxu0 %vm244_vm0, %v6111_v25  ;;  %v6398_v25 = vld [vmem:[%s5871_s9 + $0x7a] sm:$0xff] }
  0xad   : > { %5046 = vmatpush3.msra.mxu1 %v6102_v23  ;;  %4994 = vmatprep.mubr.msk.f32.mxu1 %vm244_vm0, %v6302_v12  ;;  %v6384_v23 = vld [vmem:[%s5871_s9 + $0x6a] sm:$0xff]  ;;  %v3113_v10 = vld [vmem:[%s5871_s9 + $0xfd] sm:$0xff] }
  0xae   : > { %5245 = vmatprep.mubr.msk.f32.mxu0 %vm244_vm0, %v6117_v27  ;;  %5381 = vmatprep.subr.mxu1 %v5856_v1  ;;  %v2693_v27 = vld [vmem:[%s5871_s9 + $0x134] sm:$0xff] }
  0xb0   : > { %4995 = vmatmul.mubr.msk.f32.gmra.mrb[2].mxu1 %vm244_vm0, %v6311_v13  ;;  %5246 = vmatmul.mubr.msk.f32.gmra.mrb[20].mxu0 %vm244_vm0, %v6128_v28  ;;  %v2694_v28 = vld [vmem:[%s5871_s9 + $0x13c] sm:$0xff] }
  0xb1   : > { %4997 = vmatprep.mubr.msk.f32.mxu1 %vm244_vm0, %v6316_v14  ;;  %5248 = vmatprep.mubr.msk.f32.mxu0 %vm244_vm0, %v6132_v30  ;;  %v3086_v30 = vld [vmem:[%s5871_s9 + $0x25] sm:$0xff] }
  0xb4   : > { %4998 = vmatmul.mubr.msk.f32.gmra.mrb[4].mxu1 %vm244_vm0, %v6328_v15  ;;  %5249 = vmatmul.mubr.msk.f32.gmra.mrb[22].mxu0 %vm244_vm0, %v6142_v32  ;;  %v3087_v32 = vld [vmem:[%s5871_s9 + $0x2d] sm:$0xff] }
  0xb5   : > { %5000 = vmatprep.mubr.msk.f32.mxu1 %vm244_vm0, %v6331_v16  ;;  %5251 = vmatprep.mubr.msk.f32.mxu0 %vm244_vm0, %v6146_v34  ;;  %v3088_v34 = vld [vmem:[%s5871_s9 + $0x35] sm:$0xff] }
  0xb8   : > { %5001 = vmatmul.mubr.msk.f32.gmra.mrb[6].mxu1 %vm244_vm0, %v6342_v17  ;;  %5252 = vmatmul.mubr.msk.f32.gmra.mrb[24].mxu0 %vm244_vm0, %v6156_v36  ;;  %v3089_v36 = vld [vmem:[%s5871_s9 + $0x3d] sm:$0xff] }
  0xb9   : > { %5003 = vmatprep.mubr.msk.f32.mxu1 %vm244_vm0, %v6345_v18  ;;  %5254 = vmatprep.mubr.msk.f32.mxu0 %vm244_vm0, %v6160_v38  ;;  %v3090_v38 = vld [vmem:[%s5871_s9 + $0x45] sm:$0xff] }
  0xbc   : > { %5004 = vmatmul.mubr.msk.f32.gmra.mrb[8].mxu1 %vm244_vm0, %v6356_v19  ;;  %5255 = vmatmul.mubr.msk.f32.gmra.mrb[26].mxu0 %vm244_vm0, %v6170_v40  ;;  %v3091_v40 = vld [vmem:[%s5871_s9 + $0x4d] sm:$0xff] }
  0xbd   : > { %5006 = vmatprep.mubr.msk.f32.mxu1 %vm244_vm0, %v6359_v20  ;;  %5257 = vmatprep.mubr.msk.f32.mxu0 %vm244_vm0, %v6174_v42  ;;  %v3092_v42 = vld [vmem:[%s5871_s9 + $0x55] sm:$0xff] }
  0xc0   : > { %5007 = vmatmul.mubr.msk.f32.gmra.mrb[10].mxu1 %vm244_vm0, %v6370_v21  ;;  %5258 = vmatmul.mubr.msk.f32.gmra.mrb[28].mxu0 %vm244_vm0, %v6184_v44  ;;  %v3093_v44 = vld [vmem:[%s5871_s9 + $0x5d] sm:$0xff] }
  0xc1   : > { %5009 = vmatprep.mubr.msk.f32.mxu1 %vm244_vm0, %v6373_v22  ;;  %5260 = vmatprep.mubr.msk.f32.mxu0 %vm244_vm0, %v6188_v46  ;;  %v3094_v46 = vld [vmem:[%s5871_s9 + $0x65] sm:$0xff] }
  0xc4   : > { %5010 = vmatmul.mubr.msk.f32.gmra.mrb[12].mxu1 %vm244_vm0, %v6384_v23  ;;  %5261 = vmatmul.mubr.msk.f32.gmra.mrb[30].mxu0 %vm244_vm0, %v6198_v51  ;;  %v3095_v51 = vld [vmem:[%s5871_s9 + $0x6d] sm:$0xff] }
  0xc5   : > { %5012 = vmatprep.mubr.msk.f32.mxu1 %vm244_vm0, %v6387_v24  ;;  %5263 = vmatprep.mubr.msk.f32.mxu0 %vm244_vm0, %v6202_v55  ;;  %v3096_v55 = vld [vmem:[%s5871_s9 + $0x75] sm:$0xff] }
  0xc8   : > { %5013 = vmatmul.mubr.msk.f32.gmra.mrb[14].mxu1 %vm244_vm0, %v6398_v25  ;;  %5264 = vmatmul.mubr.msk.f32.gmra.mrb[32].mxu0 %vm244_vm0, %v6212_v59  ;;  %v3097_v59 = vld [vmem:[%s5871_s9 + $0x7d] sm:$0xff] }
  0xc9   : > { %5015 = vmatprep.mubr.msk.f32.mxu1 %vm244_vm0, %v6401_v26  ;;  %5266 = vmatprep.mubr.msk.f32.mxu0 %vm244_vm0, %v2693_v27  ;;  %v3520_v27 = vld [vmem:[%s5871_s9 + $0x5e] sm:$0xff] }
  0xcc   : > { %5016 = vmatmul.mubr.msk.f32.gmra.mrb[16].mxu1 %vm244_vm0, %v6412_v11  ;;  %5267 = vmatmul.mubr.msk.f32.gmra.mrb[34].mxu0 %vm244_vm0, %v2694_v28  ;;  %v3522_v28 = vld [vmem:[%s5871_s9 + $0x6e] sm:$0xff] }
  0xcd   : > { %5018 = vmatprep.mubr.msk.f32.mxu1 %vm244_vm0, %v6416_v29  ;;  %5271 = vmatprep.mubr.msk.f32.mxu0 %vm244_vm0, %v3086_v30  ;;  %v3524_v30 = vld [vmem:[%s5871_s9 + $0x7e] sm:$0xff] }
  0xd0   : > { %5019 = vmatmul.mubr.msk.f32.gmra.mrb[18].mxu1 %vm244_vm0, %v6426_v31  ;;  %5272 = vmatmul.mubr.msk.f32.vlgmr.msra.gmra.mrb[0].mxu0 %vm244_vm0, %v3087_v32  ;;  %v3526_v32 = vld [vmem:[%s5871_s9 + $0x8e] sm:$0xff] }
  0xd1   : > { %5326 = vmatpush3.msra.mxu0 %v6226_v4  ;;  %5021 = vmatprep.mubr.msk.f32.mxu1 %vm244_vm0, %v6430_v33  ;;  %v3099_v4 = vld [vmem:[%s5871_s9 + $0x8d] sm:$0xff] }
  0xd2   : > { %5274 = vmatprep.mubr.msk.f32.mxu0 %vm244_vm0, %v3088_v34  ;;  %v3528_v34 = vld [vmem:[%s5871_s9 + $0x9e] sm:$0xff] }
  0xd4   : > { %5022 = vmatmul.mubr.msk.f32.gmra.mrb[20].mxu1 %vm244_vm0, %v6440_v35  ;;  %5275 = vmatmul.mubr.msk.f32.gmra.mrb[2].mxu0 %vm244_vm0, %v3089_v36  ;;  %v3529_v36 = vld [vmem:[%s5871_s9 + $0xa6] sm:$0xff] }
  0xd5   : > { %5024 = vmatprep.mubr.msk.f32.mxu1 %vm244_vm0, %v6445_v37  ;;  %5277 = vmatprep.mubr.msk.f32.mxu0 %vm244_vm0, %v3090_v38  ;;  %v3530_v38 = vld [vmem:[%s5871_s9 + $0xae] sm:$0xff] }
  0xd8   : > { %5025 = vmatmul.mubr.msk.f32.gmra.mrb[22].mxu1 %vm244_vm0, %v6455_v39  ;;  %5278 = vmatmul.mubr.msk.f32.gmra.mrb[4].mxu0 %vm244_vm0, %v3091_v40  ;;  %v3531_v40 = vld [vmem:[%s5871_s9 + $0xb6] sm:$0xff] }
  0xd9   : > { %5027 = vmatprep.mubr.msk.f32.mxu1 %vm244_vm0, %v6459_v41  ;;  %5280 = vmatprep.mubr.msk.f32.mxu0 %vm244_vm0, %v3092_v42  ;;  %v3532_v42 = vld [vmem:[%s5871_s9 + $0xbe] sm:$0xff] }
  0xdc   : > { %5028 = vmatmul.mubr.msk.f32.gmra.mrb[24].mxu1 %vm244_vm0, %v6469_v43  ;;  %5281 = vmatmul.mubr.msk.f32.gmra.mrb[6].mxu0 %vm244_vm0, %v3093_v44  ;;  %v3533_v44 = vld [vmem:[%s5871_s9 + $0xc6] sm:$0xff] }
  0xdd   : > { %5030 = vmatprep.mubr.msk.f32.mxu1 %vm244_vm0, %v6473_v45  ;;  %5283 = vmatprep.mubr.msk.f32.mxu0 %vm244_vm0, %v3094_v46  ;;  %v3534_v46 = vld [vmem:[%s5871_s9 + $0xce] sm:$0xff] }
  0xe0   : > { %5031 = vmatmul.mubr.msk.f32.gmra.mrb[26].mxu1 %vm244_vm0, %v6483_v49  ;;  %5284 = vmatmul.mubr.msk.f32.gmra.mrb[8].mxu0 %vm244_vm0, %v3095_v51  ;;  %v3535_v51 = vld [vmem:[%s5871_s9 + $0xd6] sm:$0xff] }
  0xe1   : > { %5033 = vmatprep.mubr.msk.f32.mxu1 %vm244_vm0, %v6487_v53  ;;  %5286 = vmatprep.mubr.msk.f32.mxu0 %vm244_vm0, %v3096_v55  ;;  %v3536_v55 = vld [vmem:[%s5871_s9 + $0xde] sm:$0xff] }
  0xe4   : > { %5034 = vmatmul.mubr.msk.f32.gmra.mrb[28].mxu1 %vm244_vm0, %v6497_v57  ;;  %5287 = vmatmul.mubr.msk.f32.gmra.mrb[10].mxu0 %vm244_vm0, %v3097_v59  ;;  %v3537_v59 = vld [vmem:[%s5871_s9 + $0xe6] sm:$0xff] }
  0xe5   : > { %5036 = vmatprep.mubr.msk.f32.mxu1 %vm244_vm0, %v6501_v61  ;;  %5289 = vmatprep.mubr.msk.f32.mxu0 %vm244_vm0, %v3098_v63  ;;  %v3538_v63 = vld [vmem:[%s5871_s9 + $0xee] sm:$0xff] }
  0xe8   : > { %5037 = vmatmul.mubr.msk.f32.gmra.mrb[30].mxu1 %vm244_vm0, %v6511_v2  ;;  %5290 = vmatmul.mubr.msk.f32.gmra.mrb[12].mxu0 %vm244_vm0, %v3099_v4  ;;  %v3539_v4 = vld [vmem:[%s5871_s9 + $0xf6] sm:$0xff] }
  0xe9   : > { %5039 = vmatprep.mubr.msk.f32.mxu1 %vm244_vm0, %v6515_v47  ;;  %5292 = vmatprep.mubr.msk.f32.mxu0 %vm244_vm0, %v3100_v6  ;;  %v3540_v6 = vld [vmem:[%s5871_s9 + $0xfe] sm:$0xff] }
  0xec   : > { %5040 = vmatmul.mubr.msk.f32.gmra.mrb[32].mxu1 %vm244_vm0, %v6525_v48  ;;  %5293 = vmatmul.mubr.msk.f32.gmra.mrb[14].mxu0 %vm244_vm0, %v3101_v50  ;;  %v3541_v50 = vld [vmem:[%s5871_s9 + $0x106] sm:$0xff] }
  0xed   : > { %5042 = vmatprep.mubr.msk.f32.mxu1 %vm244_vm0, %v6529_v52  ;;  %5295 = vmatprep.mubr.msk.f32.mxu0 %vm244_vm0, %v3102_v54  ;;  %v3542_v54 = vld [vmem:[%s5871_s9 + $0x10e] sm:$0xff] }
  0xf0   : > { %5043 = vmatmul.mubr.msk.f32.gmra.mrb[34].mxu1 %vm244_vm0, %v6539_v56  ;;  %5296 = vmatmul.mubr.msk.f32.gmra.mrb[16].mxu0 %vm244_vm0, %v3103_v58  ;;  %v3543_v58 = vld [vmem:[%s5871_s9 + $0x116] sm:$0xff] }
  0xf1   : > { %5047 = vmatprep.mubr.msk.f32.mxu1 %vm244_vm0, %v6302_v12  ;;  %5298 = vmatprep.mubr.msk.f32.mxu0 %vm244_vm0, %v3104_v60  ;;  %v3114_v12 = vld [vmem:[%s5871_s9 + $0x105] sm:$0xff] }
  0xf2   : > { %v1836_v60 = vld [vmem:[%s5871_s9 + $0x10b] sm:$0xff] }
  0xf4   : > { %5048 = vmatmul.mubr.msk.f32.vlgmr.msra.gmra.mrb[0].mxu1 %vm244_vm0, %v6311_v13  ;;  %5299 = vmatmul.mubr.msk.f32.gmra.mrb[18].mxu0 %vm244_vm0, %v3105_v62  ;;  %v3115_v13 = vld [vmem:[%s5871_s9 + $0x10d] sm:$0xff]  ;;  %v3544_v62 = vld [vmem:[%s5871_s9 + $0x11e] sm:$0xff] }
  0xf5   : > { %5382 = vmatpush3.msra.mxu1 %v5856_v1  ;;  %5050 = vmatprep.mubr.msk.f32.mxu1 %vm244_vm0, %v6316_v14  ;;  %v3109_v1 = vld [vmem:[%s5871_s9 + $0xdd] sm:$0xff]  ;;  %v3116_v14 = vld [vmem:[%s5871_s9 + $0x115] sm:$0xff] }
  0xf6   : > { %5301 = vmatprep.mubr.msk.f32.mxu0 %vm244_vm0, %v3106_v0  ;;  %v1837_v0 = vld [vmem:[%s5871_s9 + $0x113] sm:$0xff] }
  0xf8   : > { %5051 = vmatmul.mubr.msk.f32.gmra.mrb[2].mxu1 %vm244_vm0, %v6328_v15  ;;  %5302 = vmatmul.mubr.msk.f32.gmra.mrb[20].mxu0 %vm244_vm0, %v3107_v3  ;;  %v3117_v15 = vld [vmem:[%s5871_s9 + $0x11d] sm:$0xff]  ;;  %v3545_v3 = vld [vmem:[%s5871_s9 + $0x126] sm:$0xff] }
  0xf9   : > { %5053 = vmatprep.mubr.msk.f32.mxu1 %vm244_vm0, %v6331_v16  ;;  %5304 = vmatprep.mubr.msk.f32.mxu0 %vm244_vm0, %v3108_v5  ;;  %v3118_v16 = vld [vmem:[%s5871_s9 + $0x125] sm:$0xff]  ;;  %v1838_v5 = vld [vmem:[%s5871_s9 + $0x11b] sm:$0xff] }
  0xfc   : > { %5054 = vmatmul.mubr.msk.f32.gmra.mrb[4].mxu1 %vm244_vm0, %v6342_v17  ;;  %5305 = vmatmul.mubr.msk.f32.gmra.mrb[22].mxu0 %vm244_vm0, %v3109_v1  ;;  %v3119_v17 = vld [vmem:[%s5871_s9 + $0x12d] sm:$0xff] }
  0xfd   : > { %5056 = vmatprep.mubr.msk.f32.mxu1 %vm244_vm0, %v6345_v18  ;;  %5307 = vmatprep.mubr.msk.f32.mxu0 %vm244_vm0, %v3110_v7  ;;  %v3120_v18 = vld [vmem:[%s5871_s9 + $0x135] sm:$0xff]  ;;  %v1839_v7 = vld [vmem:[%s5871_s9 + $0x123] sm:$0xff] }
  0xfe   : > { %v3546_v1 = vld [vmem:[%s5871_s9 + $0x12e] sm:$0xff] }
 0x100   : > { %5057 = vmatmul.mubr.msk.f32.gmra.mrb[6].mxu1 %vm244_vm0, %v6356_v19  ;;  %5308 = vmatmul.mubr.msk.f32.gmra.mrb[24].mxu0 %vm244_vm0, %v3111_v8  ;;  %v3121_v19 = vld [vmem:[%s5871_s9 + $0x13d] sm:$0xff] }
 0x101   : > { %5059 = vmatprep.mubr.msk.f32.mxu1 %vm244_vm0, %v6359_v20  ;;  %5310 = vmatprep.mubr.msk.f32.mxu0 %vm244_vm0, %v3112_v9  ;;  %v3513_v20 = vld [vmem:[%s5871_s9 + $0x26] sm:$0xff]  ;;  %v3547_v8 = vld [vmem:[%s5871_s9 + $0x136] sm:$0xff] }
 0x102   : > { %v1840_v9 = vld [vmem:[%s5871_s9 + $0x12b] sm:$0xff] }
 0x104   : > { %5060 = vmatmul.mubr.msk.f32.gmra.mrb[8].mxu1 %vm244_vm0, %v6370_v21  ;;  %5311 = vmatmul.mubr.msk.f32.gmra.mrb[26].mxu0 %vm244_vm0, %v3113_v10  ;;  %v3514_v21 = vld [vmem:[%s5871_s9 + $0x2e] sm:$0xff]  ;;  %v3548_v10 = vld [vmem:[%s5871_s9 + $0x13e] sm:$0xff] }
 0x105   : > { %5062 = vmatprep.mubr.msk.f32.mxu1 %vm244_vm0, %v6373_v22  ;;  %5313 = vmatprep.mubr.msk.f32.mxu0 %vm244_vm0, %v3114_v12  ;;  %v3515_v22 = vld [vmem:[%s5871_s9 + $0x36] sm:$0xff] }
 0x108   : > { %5063 = vmatmul.mubr.msk.f32.gmra.mrb[10].mxu1 %vm244_vm0, %v6384_v23  ;;  %5314 = vmatmul.mubr.msk.f32.gmra.mrb[28].mxu0 %vm244_vm0, %v3115_v13  ;;  %v3516_v23 = vld [vmem:[%s5871_s9 + $0x3e] sm:$0xff] }
 0x109   : > { %5065 = vmatprep.mubr.msk.f32.mxu1 %vm244_vm0, %v6387_v24  ;;  %5316 = vmatprep.mubr.msk.f32.mxu0 %vm244_vm0, %v3116_v14  ;;  %v3517_v24 = vld [vmem:[%s5871_s9 + $0x46] sm:$0xff] }
 0x10c   : > { %5066 = vmatmul.mubr.msk.f32.gmra.mrb[12].mxu1 %vm244_vm0, %v6398_v25  ;;  %5317 = vmatmul.mubr.msk.f32.gmra.mrb[30].mxu0 %vm244_vm0, %v3117_v15  ;;  %v3518_v25 = vld [vmem:[%s5871_s9 + $0x4e] sm:$0xff] }
 0x10d   : > { %5068 = vmatprep.mubr.msk.f32.mxu1 %vm244_vm0, %v6401_v26  ;;  %5319 = vmatprep.mubr.msk.f32.mxu0 %vm244_vm0, %v3118_v16  ;;  %v3519_v26 = vld [vmem:[%s5871_s9 + $0x56] sm:$0xff] }
 0x110   : > { %5069 = vmatmul.mubr.msk.f32.gmra.mrb[14].mxu1 %vm244_vm0, %v6412_v11  ;;  %5320 = vmatmul.mubr.msk.f32.gmra.mrb[32].mxu0 %vm244_vm0, %v3119_v17  ;;  %v3521_v11 = vld [vmem:[%s5871_s9 + $0x66] sm:$0xff] }
 0x111   : > { %5071 = vmatprep.mubr.msk.f32.mxu1 %vm244_vm0, %v6416_v29  ;;  %5322 = vmatprep.mubr.msk.f32.mxu0 %vm244_vm0, %v3120_v18  ;;  %v3523_v29 = vld [vmem:[%s5871_s9 + $0x76] sm:$0xff] }
 0x114   : > { %5072 = vmatmul.mubr.msk.f32.gmra.mrb[16].mxu1 %vm244_vm0, %v6426_v31  ;;  %5323 = vmatmul.mubr.msk.f32.gmra.mrb[34].mxu0 %vm244_vm0, %v3121_v19  ;;  %v3525_v31 = vld [vmem:[%s5871_s9 + $0x86] sm:$0xff] }
 0x115   : > { %5074 = vmatprep.mubr.msk.f32.mxu1 %vm244_vm0, %v6430_v33  ;;  %5327 = vmatprep.mubr.msk.f32.mxu0 %vm244_vm0, %v3513_v20  ;;  %v3527_v33 = vld [vmem:[%s5871_s9 + $0x96] sm:$0xff] }
 0x118   : > { %5075 = vmatmul.mubr.msk.f32.gmra.mrb[18].mxu1 %vm244_vm0, %v6440_v35  ;;  %5328 = vmatmul.mubr.msk.f32.vlgmr.msra.gmra.mrb[0].mxu0 %vm244_vm0, %v3514_v21  ;;  %v1412_v35 = vld [vmem:[%s5871_s9 + $0x122] sm:$0xff] }
 0x119   : > { %5077 = vmatprep.mubr.msk.f32.mxu1 %vm244_vm0, %v6445_v37  ;;  %5330 = vmatprep.mubr.msk.f32.mxu0 %vm244_vm0, %v3515_v22  ;;  %v1413_v37 = vld [vmem:[%s5871_s9 + $0x12a] sm:$0xff] }
 0x11c   : > { %5078 = vmatmul.mubr.msk.f32.gmra.mrb[20].mxu1 %vm244_vm0, %v6455_v39  ;;  %5331 = vmatmul.mubr.msk.f32.gmra.mrb[2].mxu0 %vm244_vm0, %v3516_v23  ;;  %v1823_v39 = vld [vmem:[%s5871_s9 + $0xa3] sm:$0xff] }
 0x11d   : > { %5080 = vmatprep.mubr.msk.f32.mxu1 %vm244_vm0, %v6459_v41  ;;  %5333 = vmatprep.mubr.msk.f32.mxu0 %vm244_vm0, %v3517_v24  ;;  %v1824_v41 = vld [vmem:[%s5871_s9 + $0xab] sm:$0xff] }
 0x120   : > { %5081 = vmatmul.mubr.msk.f32.gmra.mrb[22].mxu1 %vm244_vm0, %v6469_v43  ;;  %5334 = vmatmul.mubr.msk.f32.gmra.mrb[4].mxu0 %vm244_vm0, %v3518_v25  ;;  %v1825_v43 = vld [vmem:[%s5871_s9 + $0xb3] sm:$0xff] }
 0x121   : > { %5083 = vmatprep.mubr.msk.f32.mxu1 %vm244_vm0, %v6473_v45  ;;  %5336 = vmatprep.mubr.msk.f32.mxu0 %vm244_vm0, %v3519_v26  ;;  %v1826_v45 = vld [vmem:[%s5871_s9 + $0xbb] sm:$0xff] }
 0x124   : > { %5084 = vmatmul.mubr.msk.f32.gmra.mrb[24].mxu1 %vm244_vm0, %v6483_v49  ;;  %5337 = vmatmul.mubr.msk.f32.gmra.mrb[6].mxu0 %vm244_vm0, %v3520_v27  ;;  %v1827_v49 = vld [vmem:[%s5871_s9 + $0xc3] sm:$0xff] }
 0x125   : > { %5086 = vmatprep.mubr.msk.f32.mxu1 %vm244_vm0, %v6487_v53  ;;  %5339 = vmatprep.mubr.msk.f32.mxu0 %vm244_vm0, %v3521_v11  ;;  %v1828_v53 = vld [vmem:[%s5871_s9 + $0xcb] sm:$0xff] }
 0x128   : > { %5087 = vmatmul.mubr.msk.f32.gmra.mrb[26].mxu1 %vm244_vm0, %v6497_v57  ;;  %5340 = vmatmul.mubr.msk.f32.gmra.mrb[8].mxu0 %vm244_vm0, %v3522_v28  ;;  %v1829_v57 = vld [vmem:[%s5871_s9 + $0xd3] sm:$0xff] }
 0x129   : > { %5089 = vmatprep.mubr.msk.f32.mxu1 %vm244_vm0, %v6501_v61  ;;  %5342 = vmatprep.mubr.msk.f32.mxu0 %vm244_vm0, %v3523_v29  ;;  %v1830_v61 = vld [vmem:[%s5871_s9 + $0xdb] sm:$0xff] }
 0x12c   : > { %5090 = vmatmul.mubr.msk.f32.gmra.mrb[28].mxu1 %vm244_vm0, %v6511_v2  ;;  %5343 = vmatmul.mubr.msk.f32.gmra.mrb[10].mxu0 %vm244_vm0, %v3524_v30  ;;  %v1831_v2 = vld [vmem:[%s5871_s9 + $0xe3] sm:$0xff]  ;;  %v6786_v30 = vld [vmem:[%s6928_s2] ss:$0 sm:$0xff] }
 0x12d   : > { %5092 = vmatprep.mubr.msk.f32.mxu1 %vm244_vm0, %v6515_v47  ;;  %5345 = vmatprep.mubr.msk.f32.mxu0 %vm244_vm0, %v3525_v31  ;;  %v1832_v47 = vld [vmem:[%s5871_s9 + $0xeb] sm:$0xff] }
 0x130   : > { %5093 = vmatmul.mubr.msk.f32.gmra.mrb[30].mxu1 %vm244_vm0, %v6525_v48  ;;  %5346 = vmatmul.mubr.msk.f32.gmra.mrb[12].mxu0 %vm244_vm0, %v3526_v32  ;;  %v1833_v48 = vld [vmem:[%s5871_s9 + $0xf3] sm:$0xff] }
 0x131   : > { %5095 = vmatprep.mubr.msk.f32.mxu1 %vm244_vm0, %v6529_v52  ;;  %5348 = vmatprep.mubr.msk.f32.mxu0 %vm244_vm0, %v3527_v33  ;;  %v1834_v52 = vld [vmem:[%s5871_s9 + $0xfb] sm:$0xff] }
 0x134   : > { %5096 = vmatmul.mubr.msk.f32.gmra.mrb[32].mxu1 %vm244_vm0, %v6539_v56  ;;  %5349 = vmatmul.mubr.msk.f32.gmra.mrb[14].mxu0 %vm244_vm0, %v3528_v34  ;;  %v1835_v56 = vld [vmem:[%s5871_s9 + $0x103] sm:$0xff] }
 0x135   : > { %5098 = vmatprep.mubr.msk.f32.mxu1 %vm244_vm0, %v1412_v35  ;;  %5351 = vmatprep.mubr.msk.f32.mxu0 %vm244_vm0, %v3529_v36 }
 0x138   : > { %5099 = vmatmul.mubr.msk.f32.gmra.mrb[34].mxu1 %vm244_vm0, %v1413_v37  ;;  %5352 = vmatmul.mubr.msk.f32.gmra.mrb[16].mxu0 %vm244_vm0, %v3530_v38 }
 0x139   : > { %5130 = vmatprep.mubr.msk.f32.mxu1 %vm244_vm0, %v1823_v39  ;;  %5354 = vmatprep.mubr.msk.f32.mxu0 %vm244_vm0, %v3531_v40 }
 0x13c   : > { %5131 = vmatmul.mubr.msk.f32.vlgmr.msra.gmra.mrb[18].mxu1 %vm244_vm0, %v1824_v41  ;;  %5355 = vmatmul.mubr.msk.f32.gmra.mrb[18].mxu0 %vm244_vm0, %v3532_v42 }
 0x13d   : > { %5133 = vmatprep.mubr.msk.f32.mxu1 %vm244_vm0, %v1825_v43  ;;  %5357 = vmatprep.mubr.msk.f32.mxu0 %vm244_vm0, %v3533_v44 }
 0x140   : > { %5134 = vmatmul.mubr.msk.f32.gmra.mrb[20].mxu1 %vm244_vm0, %v1826_v45  ;;  %5358 = vmatmul.mubr.msk.f32.gmra.mrb[20].mxu0 %vm244_vm0, %v3534_v46 }
 0x141   : > { %5136 = vmatprep.mubr.msk.f32.mxu1 %vm244_vm0, %v1827_v49  ;;  %5360 = vmatprep.mubr.msk.f32.mxu0 %vm244_vm0, %v3535_v51 }
 0x144   : > { %5137 = vmatmul.mubr.msk.f32.gmra.mrb[22].mxu1 %vm244_vm0, %v1828_v53  ;;  %5361 = vmatmul.mubr.msk.f32.gmra.mrb[22].mxu0 %vm244_vm0, %v3536_v55 }
 0x145   : > { %5139 = vmatprep.mubr.msk.f32.mxu1 %vm244_vm0, %v1829_v57  ;;  %5363 = vmatprep.mubr.msk.f32.mxu0 %vm244_vm0, %v3537_v59 }
 0x148   : > { %5140 = vmatmul.mubr.msk.f32.gmra.mrb[24].mxu1 %vm244_vm0, %v1830_v61  ;;  %5364 = vmatmul.mubr.msk.f32.gmra.mrb[24].mxu0 %vm244_vm0, %v3538_v63 }
 0x149   : > { %5142 = vmatprep.mubr.msk.f32.mxu1 %vm244_vm0, %v1831_v2  ;;  %5366 = vmatprep.mubr.msk.f32.mxu0 %vm244_vm0, %v3539_v4 }
 0x14c   : > { %5143 = vmatmul.mubr.msk.f32.gmra.mrb[26].mxu1 %vm244_vm0, %v1832_v47  ;;  %5367 = vmatmul.mubr.msk.f32.gmra.mrb[26].mxu0 %vm244_vm0, %v3540_v6 }
 0x14d   : > { %5145 = vmatprep.mubr.msk.f32.mxu1 %vm244_vm0, %v1833_v48  ;;  %5369 = vmatprep.mubr.msk.f32.mxu0 %vm244_vm0, %v3541_v50 }
 0x150   : > { %5146 = vmatmul.mubr.msk.f32.gmra.mrb[28].mxu1 %vm244_vm0, %v1834_v52  ;;  %5370 = vmatmul.mubr.msk.f32.gmra.mrb[28].mxu0 %vm244_vm0, %v3542_v54 }
 0x151   : > { %5148 = vmatprep.mubr.msk.f32.mxu1 %vm244_vm0, %v1835_v56  ;;  %5372 = vmatprep.mubr.msk.f32.mxu0 %vm244_vm0, %v3543_v58 }
 0x154   : > { %5149 = vmatmul.mubr.msk.f32.gmra.mrb[30].mxu1 %vm244_vm0, %v1836_v60  ;;  %5373 = vmatmul.mubr.msk.f32.gmra.mrb[30].mxu0 %vm244_vm0, %v3544_v62 }
 0x155   : > { %5151 = vmatprep.mubr.msk.f32.mxu1 %vm244_vm0, %v1837_v0  ;;  %5375 = vmatprep.mubr.msk.f32.mxu0 %vm244_vm0, %v3545_v3 }
 0x158   : > { %5152 = vmatmul.mubr.msk.f32.gmra.mrb[32].mxu1 %vm244_vm0, %v1838_v5  ;;  %5376 = vmatmul.mubr.msk.f32.gmra.mrb[32].mxu0 %vm244_vm0, %v3546_v1 }
 0x159   : > { %5154 = vmatprep.mubr.msk.f32.mxu1 %vm244_vm0, %v1839_v7  ;;  %5378 = vmatprep.mubr.msk.f32.mxu0 %vm244_vm0, %v3547_v8 }
 0x15c   : > { %5155 = vmatmul.mubr.msk.f32.gmra.mrb[34].mxu1 %vm244_vm0, %v1840_v9  ;;  %5379 = vmatmul.mubr.msk.f32.gmra.mrb[34].mxu0 %vm244_vm0, %v3548_v10 }
 0x1c7   : > { %v5049_v12 = vpop.f32.mrb[0].mxu1 }
 0x1c8   : > { %v1590_v13 = vpop.f32.mrb[1].mxu1 }
 0x1cb   : > { %v5052_v14 = vpop.f32.mrb[2].mxu1 }
 0x1cc   : > { %v1600_v15 = vpop.f32.mrb[3].mxu1 }
 0x1cf   : > { %v5055_v16 = vpop.f32.mrb[4].mxu1 }
 0x1d0   : > { %v1610_v17 = vpop.f32.mrb[5].mxu1 }
 0x1d3   : > { %v5058_v18 = vpop.f32.mrb[6].mxu1 }
 0x1d4   : > { %v1620_v19 = vpop.f32.mrb[7].mxu1 }
 0x1d7   : > { %v6762_v20 = vpop.f32.mrb[8].mxu1 }
 0x1d8   : > { %v6764_v21 = vpop.f32.mrb[9].mxu1 }
 0x1db   : > { %v6766_v22 = vpop.f32.mrb[10].mxu1 }
 0x1dc   : > { %v6768_v23 = vpop.f32.mrb[11].mxu1 }
 0x1df   : > { %v6770_v24 = vpop.f32.mrb[12].mxu1 }
 0x1e0   : > { %v6772_v25 = vpop.f32.mrb[13].mxu1 }
 0x1e3   : > { %v6774_v26 = vpop.f32.mrb[14].mxu1 }
 0x1e4   : > { %v6776_v27 = vpop.f32.mrb[15].mxu1 }
 0x1e7   : > { %v6778_v11 = vpop.f32.mrb[16].mxu1 }
 0x1e8   : > { %v6780_v28 = vpop.f32.mrb[17].mxu1 }
 0x1eb   : > { %v5329_v29 = vpop.f32.mrb[0].mxu0 }
 0x1ec   : > { %v5383_v31 = vadd.f32 %v5329_v29, %v5049_v12  ;;  %v3725_v32 = vpop.f32.mrb[1].mxu0 }
 0x1ed   : > { %v5384_v33 = vadd.f32 %v3725_v32, %v1590_v13 }
 0x1ee   : > { %v3948_v34 = vadd.f32 %v5383_v31, %v6786_v30 }
 0x1ef   : > { %v3947_v35 = vadd.f32 %v5384_v33, %v6786_v30  ;;  %v5332_v36 = vpop.f32.mrb[2].mxu0 }
 0x1f0   : > { %vm3984_vm1 = vcmp.ge.f32.partialorder %v3948_v34, 0.0  ;;  %v4020_v37 = vmul.f32 0.2, %v3948_v34  ;;  %v5385_v38 = vadd.f32 %v5332_v36, %v5052_v14  ;;  %v3735_v39 = vpop.f32.mrb[3].mxu0 }
 0x1f1   : > { %vm3983_vm2 = vcmp.ge.f32.partialorder %v3947_v35, 0.0  ;;  %v4019_v40 = vmul.f32 0.2, %v3947_v35  ;;  %v5386_v41 = vadd.f32 %v3735_v39, %v1600_v15 }
 0x1f2   : > { %v4056_v42 = vsel %vm3984_vm1, %v3948_v34, %v4020_v37  ;;  %v3950_v43 = vadd.f32 %v5385_v38, %v6786_v30 }
 0x1f3   : > { %4092 = vst [vmem:[%s6793_s6 + $0x8] sm:$0xff] %v4056_v42  ;;  %v4055_v44 = vsel %vm3983_vm2, %v3947_v35, %v4019_v40  ;;  %v3949_v45 = vadd.f32 %v5386_v41, %v6786_v30  ;;  %v5335_v46 = vpop.f32.mrb[4].mxu0 }
 0x1f4   : > { %4091 = vst [vmem:[%s6793_s6] sm:$0xff] %v4055_v44  ;;  %vm3986_vm3 = vcmp.ge.f32.partialorder %v3950_v43, 0.0  ;;  %v4022_v49 = vmul.f32 0.2, %v3950_v43  ;;  %v5387_v51 = vadd.f32 %v5335_v46, %v5055_v16  ;;  %v3745_v53 = vpop.f32.mrb[5].mxu0 }
 0x1f5   : > { %vm3985_vm4 = vcmp.ge.f32.partialorder %v3949_v45, 0.0  ;;  %v4021_v55 = vmul.f32 0.2, %v3949_v45  ;;  %v5388_v57 = vadd.f32 %v3745_v53, %v1610_v17 }
 0x1f6   : > { %v4058_v59 = vsel %vm3986_vm3, %v3950_v43, %v4022_v49  ;;  %v3952_v61 = vadd.f32 %v5387_v51, %v6786_v30 }
 0x1f7   : > { %4094 = vst [vmem:[%s6793_s6 + $0x18] sm:$0xff] %v4058_v59  ;;  %v4057_v63 = vsel %vm3985_vm4, %v3949_v45, %v4021_v55  ;;  %v3951_v2 = vadd.f32 %v5388_v57, %v6786_v30  ;;  %v5338_v4 = vpop.f32.mrb[6].mxu0 }
 0x1f8   : > { %4093 = vst [vmem:[%s6793_s6 + $0x10] sm:$0xff] %v4057_v63  ;;  %vm3988_vm5 = vcmp.ge.f32.partialorder %v3952_v61, 0.0  ;;  %v4024_v47 = vmul.f32 0.2, %v3952_v61  ;;  %v5389_v6 = vadd.f32 %v5338_v4, %v5058_v18  ;;  %v3755_v48 = vpop.f32.mrb[7].mxu0 }
 0x1f9   : > { %vm3987_vm6 = vcmp.ge.f32.partialorder %v3951_v2, 0.0  ;;  %v4023_v50 = vmul.f32 0.2, %v3951_v2  ;;  %v5390_v52 = vadd.f32 %v3755_v48, %v1620_v19 }
 0x1fa   : > { %v4060_v54 = vsel %vm3988_vm5, %v3952_v61, %v4024_v47  ;;  %v3954_v56 = vadd.f32 %v5389_v6, %v6786_v30 }
 0x1fb   : > { %4096 = vst [vmem:[%s6793_s6 + $0x28] sm:$0xff] %v4060_v54  ;;  %v4059_v58 = vsel %vm3987_vm6, %v3951_v2, %v4023_v50  ;;  %v3953_v60 = vadd.f32 %v5390_v52, %v6786_v30  ;;  %v5341_v62 = vpop.f32.mrb[8].mxu0 }
 0x1fc   : > { %4095 = vst [vmem:[%s6793_s6 + $0x20] sm:$0xff] %v4059_v58  ;;  %vm3990_vm7 = vcmp.ge.f32.partialorder %v3954_v56, 0.0  ;;  %v4026_v0 = vmul.f32 0.2, %v3954_v56  ;;  %v5391_v3 = vadd.f32 %v5341_v62, %v6762_v20  ;;  %v3765_v5 = vpop.f32.mrb[9].mxu0 }
 0x1fd   : > { %vm3989_vm8 = vcmp.ge.f32.partialorder %v3953_v60, 0.0  ;;  %v4025_v1 = vmul.f32 0.2, %v3953_v60  ;;  %v5392_v7 = vadd.f32 %v3765_v5, %v6764_v21 }
 0x1fe   : > { %v4062_v8 = vsel %vm3990_vm7, %v3954_v56, %v4026_v0  ;;  %v3956_v9 = vadd.f32 %v5391_v3, %v6786_v30 }
 0x1ff   : > { %4098 = vst [vmem:[%s6793_s6 + $0x38] sm:$0xff] %v4062_v8  ;;  %v4061_v10 = vsel %vm3989_vm8, %v3953_v60, %v4025_v1  ;;  %v3955_v12 = vadd.f32 %v5392_v7, %v6786_v30  ;;  %v5344_v13 = vpop.f32.mrb[10].mxu0 }
 0x200   : > { %4097 = vst [vmem:[%s6793_s6 + $0x30] sm:$0xff] %v4061_v10  ;;  %vm3992_vm9 = vcmp.ge.f32.partialorder %v3956_v9, 0.0  ;;  %v4028_v14 = vmul.f32 0.2, %v3956_v9  ;;  %v5393_v15 = vadd.f32 %v5344_v13, %v6766_v22  ;;  %v3775_v16 = vpop.f32.mrb[11].mxu0 }
 0x201   : > { %vm3991_vm10 = vcmp.ge.f32.partialorder %v3955_v12, 0.0  ;;  %v4027_v17 = vmul.f32 0.2, %v3955_v12  ;;  %v5394_v18 = vadd.f32 %v3775_v16, %v6768_v23 }
 0x202   : > { %v4064_v19 = vsel %vm3992_vm9, %v3956_v9, %v4028_v14  ;;  %v3958_v20 = vadd.f32 %v5393_v15, %v6786_v30 }
 0x203   : > { %4100 = vst [vmem:[%s6793_s6 + $0x48] sm:$0xff] %v4064_v19  ;;  %v4063_v21 = vsel %vm3991_vm10, %v3955_v12, %v4027_v17  ;;  %v3957_v29 = vadd.f32 %v5394_v18, %v6786_v30  ;;  %v5347_v31 = vpop.f32.mrb[12].mxu0 }
 0x204   : > { %4099 = vst [vmem:[%s6793_s6 + $0x40] sm:$0xff] %v4063_v21  ;;  %vm3994_vm11 = vcmp.ge.f32.partialorder %v3958_v20, 0.0  ;;  %v4030_v32 = vmul.f32 0.2, %v3958_v20  ;;  %v5395_v22 = vadd.f32 %v5347_v31, %v6770_v24  ;;  %v3785_v33 = vpop.f32.mrb[13].mxu0 }
 0x205   : > { %vm3993_vm12 = vcmp.ge.f32.partialorder %v3957_v29, 0.0  ;;  %v4029_v34 = vmul.f32 0.2, %v3957_v29  ;;  %v5396_v23 = vadd.f32 %v3785_v33, %v6772_v25 }
 0x206   : > { %v4066_v35 = vsel %vm3994_vm11, %v3958_v20, %v4030_v32  ;;  %v3960_v36 = vadd.f32 %v5395_v22, %v6786_v30 }
 0x207   : > { %4102 = vst [vmem:[%s6793_s6 + $0x58] sm:$0xff] %v4066_v35  ;;  %v4065_v37 = vsel %vm3993_vm12, %v3957_v29, %v4029_v34  ;;  %v3959_v38 = vadd.f32 %v5396_v23, %v6786_v30  ;;  %v5350_v39 = vpop.f32.mrb[14].mxu0 }
 0x208   : > { %4101 = vst [vmem:[%s6793_s6 + $0x50] sm:$0xff] %v4065_v37  ;;  %vm3996_vm13 = vcmp.ge.f32.partialorder %v3960_v36, 0.0  ;;  %v4032_v40 = vmul.f32 0.2, %v3960_v36  ;;  %v5397_v24 = vadd.f32 %v5350_v39, %v6774_v26  ;;  %v3795_v41 = vpop.f32.mrb[15].mxu0 }
 0x209   : > { %vm3995_vm14 = vcmp.ge.f32.partialorder %v3959_v38, 0.0  ;;  %v4031_v42 = vmul.f32 0.2, %v3959_v38  ;;  %v5398_v25 = vadd.f32 %v3795_v41, %v6776_v27 }
 0x20a   : > { %v4068_v43 = vsel %vm3996_vm13, %v3960_v36, %v4032_v40  ;;  %v3962_v44 = vadd.f32 %v5397_v24, %v6786_v30 }
 0x20b   : > { %4104 = vst [vmem:[%s6793_s6 + $0x68] sm:$0xff] %v4068_v43  ;;  %v4067_v45 = vsel %vm3995_vm14, %v3959_v38, %v4031_v42  ;;  %v3961_v46 = vadd.f32 %v5398_v25, %v6786_v30  ;;  %v5353_v49 = vpop.f32.mrb[16].mxu0 }
 0x20c   : > { %4103 = vst [vmem:[%s6793_s6 + $0x60] sm:$0xff] %v4067_v45  ;;  %vm3998_vm15 = vcmp.ge.f32.partialorder %v3962_v44, 0.0  ;;  %v4034_v51 = vmul.f32 0.2, %v3962_v44  ;;  %v5399_v26 = vadd.f32 %v5353_v49, %v6778_v11  ;;  %v3805_v53 = vpop.f32.mrb[17].mxu0 }
 0x20d   : > { %vm3997_vm0 = vcmp.ge.f32.partialorder %v3961_v46, 0.0  ;;  %v4033_v55 = vmul.f32 0.2, %v3961_v46  ;;  %v5400_v27 = vadd.f32 %v3805_v53, %v6780_v28 }
 0x20e   : > { %v4070_v57 = vsel %vm3998_vm15, %v3962_v44, %v4034_v51  ;;  %v3964_v59 = vadd.f32 %v5399_v26, %v6786_v30 }
 0x20f   : > { %4106 = vst [vmem:[%s6793_s6 + $0x78] sm:$0xff] %v4070_v57  ;;  %v4069_v61 = vsel %vm3997_vm0, %v3961_v46, %v4033_v55  ;;  %v3963_v63 = vadd.f32 %v5400_v27, %v6786_v30  ;;  %v5132_v2 = vpop.f32.mrb[18].mxu1  ;;  %v5356_v4 = vpop.f32.mrb[18].mxu0 }
 0x210   : > { %4105 = vst [vmem:[%s6793_s6 + $0x70] sm:$0xff] %v4069_v61  ;;  %vm4000_vm1 = vcmp.ge.f32.partialorder %v3964_v59, 0.0  ;;  %v4036_v47 = vmul.f32 0.2, %v3964_v59  ;;  %v5401_v11 = vadd.f32 %v5356_v4, %v5132_v2  ;;  %v2107_v6 = vpop.f32.mrb[19].mxu1  ;;  %v3815_v48 = vpop.f32.mrb[19].mxu0 }
 0x211   : > { %vm3999_vm2 = vcmp.ge.f32.partialorder %v3963_v63, 0.0  ;;  %v4035_v50 = vmul.f32 0.2, %v3963_v63  ;;  %v5402_v28 = vadd.f32 %v3815_v48, %v2107_v6 }
 0x212   : > { %v4072_v52 = vsel %vm4000_vm1, %v3964_v59, %v4036_v47  ;;  %v3966_v54 = vadd.f32 %v5401_v11, %v6786_v30 }
 0x213   : > { %4108 = vst [vmem:[%s6793_s6 + $0x88] sm:$0xff] %v4072_v52  ;;  %v4071_v56 = vsel %vm3999_vm2, %v3963_v63, %v4035_v50  ;;  %v3965_v58 = vadd.f32 %v5402_v28, %v6786_v30  ;;  %v5135_v60 = vpop.f32.mrb[20].mxu1  ;;  %v5359_v62 = vpop.f32.mrb[20].mxu0 }
 0x214   : > { %4107 = vst [vmem:[%s6793_s6 + $0x80] sm:$0xff] %v4071_v56  ;;  %vm4002_vm3 = vcmp.ge.f32.partialorder %v3966_v54, 0.0  ;;  %v4038_v0 = vmul.f32 0.2, %v3966_v54  ;;  %v5403_v3 = vadd.f32 %v5359_v62, %v5135_v60  ;;  %v2117_v5 = vpop.f32.mrb[21].mxu1  ;;  %v3825_v1 = vpop.f32.mrb[21].mxu0 }
 0x215   : > { %vm4001_vm4 = vcmp.ge.f32.partialorder %v3965_v58, 0.0  ;;  %v4037_v7 = vmul.f32 0.2, %v3965_v58  ;;  %v5404_v8 = vadd.f32 %v3825_v1, %v2117_v5 }
 0x216   : > { %v4074_v9 = vsel %vm4002_vm3, %v3966_v54, %v4038_v0  ;;  %v3968_v10 = vadd.f32 %v5403_v3, %v6786_v30 }
 0x217   : > { %4110 = vst [vmem:[%s6793_s6 + $0x98] sm:$0xff] %v4074_v9  ;;  %v4073_v12 = vsel %vm4001_vm4, %v3965_v58, %v4037_v7  ;;  %v3967_v13 = vadd.f32 %v5404_v8, %v6786_v30  ;;  %v5138_v14 = vpop.f32.mrb[22].mxu1  ;;  %v5362_v15 = vpop.f32.mrb[22].mxu0 }
 0x218   : > { %4109 = vst [vmem:[%s6793_s6 + $0x90] sm:$0xff] %v4073_v12  ;;  %vm4004_vm5 = vcmp.ge.f32.partialorder %v3968_v10, 0.0  ;;  %v4040_v16 = vmul.f32 0.2, %v3968_v10  ;;  %v5405_v17 = vadd.f32 %v5362_v15, %v5138_v14  ;;  %v2127_v18 = vpop.f32.mrb[23].mxu1  ;;  %v3835_v19 = vpop.f32.mrb[23].mxu0 }
 0x219   : > { %vm4003_vm6 = vcmp.ge.f32.partialorder %v3967_v13, 0.0  ;;  %v4039_v20 = vmul.f32 0.2, %v3967_v13  ;;  %v5406_v21 = vadd.f32 %v3835_v19, %v2127_v18 }
 0x21a   : > { %v4076_v29 = vsel %vm4004_vm5, %v3968_v10, %v4040_v16  ;;  %v3970_v31 = vadd.f32 %v5405_v17, %v6786_v30 }
 0x21b   : > { %4112 = vst [vmem:[%s6793_s6 + $0xa8] sm:$0xff] %v4076_v29  ;;  %v4075_v32 = vsel %vm4003_vm6, %v3967_v13, %v4039_v20  ;;  %v3969_v22 = vadd.f32 %v5406_v21, %v6786_v30  ;;  %v5141_v33 = vpop.f32.mrb[24].mxu1  ;;  %v5365_v34 = vpop.f32.mrb[24].mxu0 }
 0x21c   : > { %4111 = vst [vmem:[%s6793_s6 + $0xa0] sm:$0xff] %v4075_v32  ;;  %vm4006_vm7 = vcmp.ge.f32.partialorder %v3970_v31, 0.0  ;;  %v4042_v23 = vmul.f32 0.2, %v3970_v31  ;;  %v5407_v35 = vadd.f32 %v5365_v34, %v5141_v33  ;;  %v2137_v36 = vpop.f32.mrb[25].mxu1  ;;  %v3845_v37 = vpop.f32.mrb[25].mxu0 }
 0x21d   : > { %vm4005_vm8 = vcmp.ge.f32.partialorder %v3969_v22, 0.0  ;;  %v4041_v38 = vmul.f32 0.2, %v3969_v22  ;;  %v5408_v39 = vadd.f32 %v3845_v37, %v2137_v36 }
 0x21e   : > { %v4078_v40 = vsel %vm4006_vm7, %v3970_v31, %v4042_v23  ;;  %v3972_v24 = vadd.f32 %v5407_v35, %v6786_v30 }
 0x21f   : > { %4114 = vst [vmem:[%s6793_s6 + $0xb8] sm:$0xff] %v4078_v40  ;;  %v4077_v41 = vsel %vm4005_vm8, %v3969_v22, %v4041_v38  ;;  %v3971_v42 = vadd.f32 %v5408_v39, %v6786_v30  ;;  %v5144_v25 = vpop.f32.mrb[26].mxu1  ;;  %v5368_v43 = vpop.f32.mrb[26].mxu0 }
 0x220   : > { %4113 = vst [vmem:[%s6793_s6 + $0xb0] sm:$0xff] %v4077_v41  ;;  %vm4008_vm9 = vcmp.ge.f32.partialorder %v3972_v24, 0.0  ;;  %v4044_v44 = vmul.f32 0.2, %v3972_v24  ;;  %v5409_v45 = vadd.f32 %v5368_v43, %v5144_v25  ;;  %v2147_v46 = vpop.f32.mrb[27].mxu1  ;;  %v3855_v49 = vpop.f32.mrb[27].mxu0 }
 0x221   : > { %vm4007_vm10 = vcmp.ge.f32.partialorder %v3971_v42, 0.0  ;;  %v4043_v51 = vmul.f32 0.2, %v3971_v42  ;;  %v5410_v26 = vadd.f32 %v3855_v49, %v2147_v46 }
 0x222   : > { %v4080_v53 = vsel %vm4008_vm9, %v3972_v24, %v4044_v44  ;;  %v3974_v55 = vadd.f32 %v5409_v45, %v6786_v30 }
 0x223   : > { %4116 = vst [vmem:[%s6793_s6 + $0xc8] sm:$0xff] %v4080_v53  ;;  %v4079_v27 = vsel %vm4007_vm10, %v3971_v42, %v4043_v51  ;;  %v3973_v57 = vadd.f32 %v5410_v26, %v6786_v30  ;;  %v5147_v59 = vpop.f32.mrb[28].mxu1  ;;  %v5371_v61 = vpop.f32.mrb[28].mxu0 }
 0x224   : > { %4115 = vst [vmem:[%s6793_s6 + $0xc0] sm:$0xff] %v4079_v27  ;;  %vm4010_vm11 = vcmp.ge.f32.partialorder %v3974_v55, 0.0  ;;  %v4046_v63 = vmul.f32 0.2, %v3974_v55  ;;  %v5411_v2 = vadd.f32 %v5371_v61, %v5147_v59  ;;  %v2157_v4 = vpop.f32.mrb[29].mxu1  ;;  %v3865_v47 = vpop.f32.mrb[29].mxu0 }
 0x225   : > { %vm4009_vm12 = vcmp.ge.f32.partialorder %v3973_v57, 0.0  ;;  %v4045_v11 = vmul.f32 0.2, %v3973_v57  ;;  %v5412_v6 = vadd.f32 %v3865_v47, %v2157_v4 }
 0x226   : > { %v4082_v48 = vsel %vm4010_vm11, %v3974_v55, %v4046_v63  ;;  %v3976_v50 = vadd.f32 %v5411_v2, %v6786_v30 }
 0x227   : > { %4118 = vst [vmem:[%s6793_s6 + $0xd8] sm:$0xff] %v4082_v48  ;;  %v4081_v28 = vsel %vm4009_vm12, %v3973_v57, %v4045_v11  ;;  %v3975_v52 = vadd.f32 %v5412_v6, %v6786_v30  ;;  %v5150_v54 = vpop.f32.mrb[30].mxu1  ;;  %v5374_v56 = vpop.f32.mrb[30].mxu0 }
 0x228   : > { %4117 = vst [vmem:[%s6793_s6 + $0xd0] sm:$0xff] %v4081_v28  ;;  %vm4012_vm13 = vcmp.ge.f32.partialorder %v3976_v50, 0.0  ;;  %v4048_v58 = vmul.f32 0.2, %v3976_v50  ;;  %v5413_v60 = vadd.f32 %v5374_v56, %v5150_v54  ;;  %v2167_v62 = vpop.f32.mrb[31].mxu1  ;;  %v3875_v0 = vpop.f32.mrb[31].mxu0 }
 0x229   : > { %vm4011_vm14 = vcmp.ge.f32.partialorder %v3975_v52, 0.0  ;;  %v4047_v3 = vmul.f32 0.2, %v3975_v52  ;;  %v5414_v5 = vadd.f32 %v3875_v0, %v2167_v62 }
 0x22a   : > { %v4084_v1 = vsel %vm4012_vm13, %v3976_v50, %v4048_v58  ;;  %v3978_v7 = vadd.f32 %v5413_v60, %v6786_v30 }
 0x22b   : > { %4120 = vst [vmem:[%s6793_s6 + $0xe8] sm:$0xff] %v4084_v1  ;;  %v4083_v8 = vsel %vm4011_vm14, %v3975_v52, %v4047_v3  ;;  %v3977_v9 = vadd.f32 %v5414_v5, %v6786_v30  ;;  %v5153_v10 = vpop.f32.mrb[32].mxu1  ;;  %v5377_v12 = vpop.f32.mrb[32].mxu0 }
 0x22c   : > { %4119 = vst [vmem:[%s6793_s6 + $0xe0] sm:$0xff] %v4083_v8  ;;  %vm4014_vm15 = vcmp.ge.f32.partialorder %v3978_v7, 0.0  ;;  %v4050_v13 = vmul.f32 0.2, %v3978_v7  ;;  %v5415_v14 = vadd.f32 %v5377_v12, %v5153_v10  ;;  %v2177_v15 = vpop.f32.mrb[33].mxu1  ;;  %v3885_v16 = vpop.f32.mrb[33].mxu0 }
 0x22d   : > { %vm4013_vm0 = vcmp.ge.f32.partialorder %v3977_v9, 0.0  ;;  %v4049_v17 = vmul.f32 0.2, %v3977_v9  ;;  %v5416_v18 = vadd.f32 %v3885_v16, %v2177_v15 }
 0x22e   : > { %v4086_v19 = vsel %vm4014_vm15, %v3978_v7, %v4050_v13  ;;  %v3980_v20 = vadd.f32 %v5415_v14, %v6786_v30 }
 0x22f   : > { %4122 = vst [vmem:[%s6793_s6 + $0xf8] sm:$0xff] %v4086_v19  ;;  %v4085_v21 = vsel %vm4013_vm0, %v3977_v9, %v4049_v17  ;;  %v3979_v29 = vadd.f32 %v5416_v18, %v6786_v30  ;;  %v5156_v31 = vpop.f32.mrb[34].mxu1  ;;  %v5380_v32 = vpop.f32.mrb[34].mxu0 }
 0x230   : > { %4121 = vst [vmem:[%s6793_s6 + $0xf0] sm:$0xff] %v4085_v21  ;;  %vm4016_vm1 = vcmp.ge.f32.partialorder %v3980_v20, 0.0  ;;  %v4052_v22 = vmul.f32 0.2, %v3980_v20  ;;  %v5417_v33 = vadd.f32 %v5380_v32, %v5156_v31  ;;  %v2187_v34 = vpop.f32.mrb[35].mxu1  ;;  %v3895_v23 = vpop.f32.mrb[35].mxu0 }
 0x231   : > { %vm4015_vm2 = vcmp.ge.f32.partialorder %v3979_v29, 0.0  ;;  %v4051_v35 = vmul.f32 0.2, %v3979_v29  ;;  %v5418_v36 = vadd.f32 %v3895_v23, %v2187_v34 }
 0x232   : > { %v4088_v37 = vsel %vm4016_vm1, %v3980_v20, %v4052_v22  ;;  %v3982_v38 = vadd.f32 %v5417_v33, %v6786_v30 }
 0x233   : > { %4124 = vst [vmem:[%s6793_s6 + $0x108] sm:$0xff] %v4088_v37  ;;  %v4087_v39 = vsel %vm4015_vm2, %v3979_v29, %v4051_v35  ;;  %v3981_v40 = vadd.f32 %v5418_v36, %v6786_v30 }
 0x234   : > { %4123 = vst [vmem:[%s6793_s6 + $0x100] sm:$0xff] %v4087_v39  ;;  %vm4018_vm3 = vcmp.ge.f32.partialorder %v3982_v38, 0.0  ;;  %v4054_v24 = vmul.f32 0.2, %v3982_v38 }
 0x235   : > { %vm4017_vm4 = vcmp.ge.f32.partialorder %v3981_v40, 0.0  ;;  %v4053_v41 = vmul.f32 0.2, %v3981_v40 }
 0x236   : > { %v4090_v42 = vsel %vm4018_vm3, %v3982_v38, %v4054_v24 }
 0x237   : > { %4126 = vst [vmem:[%s6793_s6 + $0x118] sm:$0xff] %v4090_v42  ;;  %v4089_v25 = vsel %vm4017_vm4, %v3981_v40, %v4053_v41 }
 0x238   : > { %4125 = vst [vmem:[%s6793_s6 + $0x110] sm:$0xff] %v4089_v25 }
 0x239   : > { %5728 = shalt.err (!%p5725_p3)
}
 0x23a   : > { %s5729_s25 = scalar_lea.hbm %s6877_s16, 4608  ;;  %s5733_s28 = scalar_lea.hbm %s6929_s3, 9216 }
 0x23b   : > { %p5730_p4 = scmp.ne.s32.totalorder %s6877_s16, %s5729_s25  ;;  %p5734_p9 = scmp.lt.u32.totalorder %s6877_s16, %s6929_s3 }
 0x23c   : > { %p5735_p10 = scmp.lt.u32.totalorder %s5733_s28, %s5729_s25  ;;  %p5737_p12 = scmp.lt.u32.totalorder %s5729_s25, %s6877_s16 }
 0x23d   : > { %p5731_p7 = pnand %p5730_p4, %p5840_p5 }
 0x23e   : > { %p5736_p11 = por %p5735_p10, %p5734_p9 }
 0x23f   : > { %p5732_p8 = pneg %p5731_p7 }
 0x240   : > { %p5738_p13 = por %p5737_p12, %p5736_p11 }
 0x242   : > { %p5739_p0 = pnand %p5738_p13, %p5732_p8 }
 0x244   : > { %5742 = shalt.err (!%p5739_p0)
}
 0x245   : > { %s5780_s4 = smov 128   ;;  %s5781_s5 = smov 8  }
 0x246   : > { %5674 = dma.vmem_to_hbm [thread:$0]  (%p5840_p5), %s6879_s8, 4608, %s6877_s16, %s6885_s11, %s5780_s4, %s5780_s4, %s5781_s5  }
 0x247 PF: > { %p5680_p1 = scmp.ge.s32.totalorder %s5777_s15, 2  ;;  %s4156_s6 = sand.u32 1, %s5765_s12  }
 0x248   : > { %s4157_s7 = scalar_lea.sflag [#allocation3], %s4156_s6 }
 0x249   : > { %p5677_p2 = pnand %p5680_p1, %p5844_p6 }
 0x24b   : > { %5760 = dma.done.wait (!%p5677_p2), %s4157_s7, 4608  }
 0x24c   : > { %5762 = vsyncadd (!%p5677_p2), %s4157_s7, 4294962688  ;;  %p13_p3 = scmp.ge.s32.totalorder %s5827_s18, 4   ;;  %s6932_s12 = smov %s5769_s13 }
 0x24d   : > { %s6933_s13 = smov %s5773_s14  ;;  %s6934_s14 = smov %s5838_s21 }
 0x24e   : > { %s6935_s15 = smov %s5827_s18  ;;  %15 = sbr.rel (!%p13_p3) target bundleno = 3 (0x3), region = 75 }
 0x255   :  { %4162 = vsyncpa [#allocation3], 1 }
 0x256   :  { %4164 = vsyncpa [#allocation3 + $0x1], 1 }

</bundles_post_ra>
